<compile_context>
chip_gen: v6e
topology: v6e:2x2x1
jax: 0.10.0
libtpu: 0.0.40
codegen_flags: <defaults>
</compile_context>

<pallas_src>
import functools

import jax
import jax.numpy as jnp
from jax.experimental import pallas as pl
from jax.experimental.pallas import tpu as pltpu


def mlp_kernel(x_ref,
               w1_ref, b1_ref,
               w2_ref, b2_ref,
               w3_ref, b3_ref,
               w4_ref, b4_ref,
               o_ref):
    # Layer 1: (TB, 1024)bf16 @ (1024, 512)bf16 -> f32 acc, +bias, ReLU
    h = jnp.dot(x_ref[...], w1_ref[...], preferred_element_type=jnp.float32)
    h = jnp.maximum(h + b1_ref[...], 0.0).astype(jnp.bfloat16)

    # Layer 2: (TB, 512) @ (512, 384pad)
    h = jnp.dot(h, w2_ref[...], preferred_element_type=jnp.float32)
    h = jnp.maximum(h + b2_ref[...], 0.0).astype(jnp.bfloat16)

    # Layer 3: (TB, 384pad) @ (384pad, 128pad)
    h = jnp.dot(h, w3_ref[...], preferred_element_type=jnp.float32)
    h = jnp.maximum(h + b3_ref[...], 0.0).astype(jnp.bfloat16)

    # Dropout(0.5) in eval mode == identity.

    # Layer 4: (TB, 128pad) @ (128pad, 128pad)
    h = jnp.dot(h, w4_ref[...], preferred_element_type=jnp.float32)
    o_ref[...] = (h + b4_ref[...]).astype(o_ref.dtype)


def _round_up(n, m):
    return ((n + m - 1) // m) * m


def _pad_to(x, rows, cols):
    r, c = x.shape
    return jnp.pad(x, ((0, rows - r), (0, cols - c)))


def prepare_params(params):
    """One-time host-side prep: pad weights/biases to lane-aligned widths and
    cast weights to bf16.  Returns (padded_param_tuple, d_out)."""
    (w1, b1), (w2, b2), (w3, b3), (w4, b4) = params
    d_in = w1.shape[0]
    d1, d2, d3, d4 = w1.shape[1], w2.shape[1], w3.shape[1], w4.shape[1]
    d1p, d2p, d3p, d4p = (_round_up(d, 128) for d in (d1, d2, d3, d4))

    w1p = _pad_to(w1, d_in, d1p).astype(jnp.bfloat16)
    w2p = _pad_to(w2, d1p, d2p).astype(jnp.bfloat16)
    w3p = _pad_to(w3, d2p, d3p).astype(jnp.bfloat16)
    w4p = _pad_to(w4, d3p, d4p).astype(jnp.bfloat16)
    b1p = _pad_to(b1.reshape(1, -1), 1, d1p).astype(jnp.float32)
    b2p = _pad_to(b2.reshape(1, -1), 1, d2p).astype(jnp.float32)
    b3p = _pad_to(b3.reshape(1, -1), 1, d3p).astype(jnp.float32)
    b4p = _pad_to(b4.reshape(1, -1), 1, d4p).astype(jnp.float32)

    padded = (w1p, b1p, w2p, b2p, w3p, b3p, w4p, b4p)
    return padded, d4


@functools.partial(jax.jit, static_argnames=("d_out", "tb"))
def nn_model_forward(x, padded_params, *, d_out, tb=256):
    """x: (B, ...) flattened to (B, d_in). Returns (B, d_out) f32 logits."""
    w1p, b1p, w2p, b2p, w3p, b3p, w4p, b4p = padded_params

    B = x.shape[0]
    x = x.reshape(B, -1).astype(jnp.bfloat16)
    d_in = x.shape[1]
    d1p, d2p, d3p, d4p = w1p.shape[1], w2p.shape[1], w3p.shape[1], w4p.shape[1]

    # Batch tile: default 256 (full 256-wide MXU rows on v6e/v7x); clamp for
    # small batches, keep sublane-aligned (multiple of 8).
    tb_eff = min(tb, _round_up(B, 8))
    Bp = _round_up(B, tb_eff)
    if Bp != B:
        x = jnp.pad(x, ((0, Bp - B), (0, 0)))

    grid = (Bp // tb_eff,)

    # Weights/biases are replicated (constant block) across the batch grid.
    def rep(shape):
        return pl.BlockSpec(shape, lambda i: (0, 0))

    out_padded = pl.pallas_call(
        mlp_kernel,
        out_shape=jax.ShapeDtypeStruct((Bp, d4p), jnp.float32),
        grid_spec=pltpu.PrefetchScalarGridSpec(
            num_scalar_prefetch=0,
            grid=grid,
            in_specs=[
                pl.BlockSpec((tb_eff, d_in), lambda i: (i, 0)),
                rep((d_in, d1p)), rep((1, d1p)),
                rep((d1p, d2p)), rep((1, d2p)),
                rep((d2p, d3p)), rep((1, d3p)),
                rep((d3p, d4p)), rep((1, d4p)),
            ],
            out_specs=pl.BlockSpec((tb_eff, d4p), lambda i: (i, 0)),
        ),
        compiler_params=pltpu.CompilerParams(
            dimension_semantics=("parallel",)),
    )(x, w1p, b1p, w2p, b2p, w3p, b3p, w4p, b4p)

    return out_padded[:B, :d_out]


def init_params(key, d_in=1024, nlabels=10):
    """Deterministic init mirroring the PyTorch module:
    kaiming_normal_ on weights (std = sqrt(2 / fan_in)),
    default Linear bias init U(-1/sqrt(fan_in), 1/sqrt(fan_in))."""
    dims = [d_in, int(d_in * 0.5), 300, 100, nlabels]
    params = []
    for fan_in, fan_out in zip(dims[:-1], dims[1:]):
        key, kw, kb = jax.random.split(key, 3)
        std = (2.0 / fan_in) ** 0.5
        # stored as (fan_in, fan_out) = transpose of torch's (out, in)
        w = std * jax.random.normal(kw, (fan_in, fan_out), dtype=jnp.float32)
        bound = 1.0 / (fan_in ** 0.5)
        b = jax.random.uniform(kb, (fan_out,), minval=-bound, maxval=bound,
                               dtype=jnp.float32)
        params.append((w, b))
    return tuple(params)


def reference_forward(x, params):
    """Pure-JAX f32 reference for a sanity check."""
    B = x.shape[0]
    h = x.reshape(B, -1).astype(jnp.float32)
    (w1, b1), (w2, b2), (w3, b3), (w4, b4) = params
    h = jnp.maximum(h @ w1 + b1, 0.0)
    h = jnp.maximum(h @ w2 + b2, 0.0)
    h = jnp.maximum(h @ w3 + b3, 0.0)
    return h @ w4 + b4


if __name__ == "__main__":
    key = jax.random.PRNGKey(0)
    k_x, k_p = jax.random.split(key)

    d_in, nlabels = 1024, 10
    params = init_params(k_p, d_in=d_in, nlabels=nlabels)
    padded_params, d_out = prepare_params(params)

    # Small batch (tb clamps to 8, grid=(1,)) and a larger batch that
    # exercises tb=256 tiles and a multi-step grid.
    for batch in (8, 512):
        kx = jax.random.fold_in(k_x, batch)
        x = jax.random.normal(kx, (batch, d_in), dtype=jnp.float32)

        out = nn_model_forward(x, padded_params, d_out=d_out, tb=256)
        out = jax.block_until_ready(out)

        ref = reference_forward(x, params)
        assert out.shape == (batch, nlabels), out.shape
        # bf16 matmul inputs with f32 accumulation -> loosened tolerance.
        assert jnp.allclose(out, ref, atol=2.5e-1, rtol=5e-2), (
            float(jnp.max(jnp.abs(out - ref))))

    print("KERNEL_OK")
</pallas_src>

<mosaic_0001>
module attributes {stable_mosaic.version = 11 : i64} {
  func.func @mlp_kernel(%arg0: i32, %arg1: memref<8x1024xbf16, #tpu.memory_space<vmem>>, %arg2: memref<1024x512xbf16, #tpu.memory_space<vmem>>, %arg3: memref<1x512xf32, #tpu.memory_space<vmem>>, %arg4: memref<512x384xbf16, #tpu.memory_space<vmem>>, %arg5: memref<1x384xf32, #tpu.memory_space<vmem>>, %arg6: memref<384x128xbf16, #tpu.memory_space<vmem>>, %arg7: memref<1x128xf32, #tpu.memory_space<vmem>>, %arg8: memref<128x128xbf16, #tpu.memory_space<vmem>>, %arg9: memref<1x128xf32, #tpu.memory_space<vmem>>, %arg10: memref<8x128xf32, #tpu.memory_space<vmem>>) attributes {dimension_semantics = [#tpu.dimension_semantics<parallel>], iteration_bounds = array<i64: 1>, scalar_prefetch = 0 : i64, scratch_operands = 0 : i64, tpu.core_type = #tpu.core_type<tc>, window_params = [{transform_indices = @transform_0, window_bounds = array<i64: 8, 1024>}, {pipeline_mode = #tpu.pipeline_mode<synchronous>, transform_indices = @transform_1, window_bounds = array<i64: 1024, 512>}, {pipeline_mode = #tpu.pipeline_mode<synchronous>, transform_indices = @transform_2, window_bounds = array<i64: 1, 512>}, {pipeline_mode = #tpu.pipeline_mode<synchronous>, transform_indices = @transform_3, window_bounds = array<i64: 512, 384>}, {pipeline_mode = #tpu.pipeline_mode<synchronous>, transform_indices = @transform_4, window_bounds = array<i64: 1, 384>}, {pipeline_mode = #tpu.pipeline_mode<synchronous>, transform_indices = @transform_5, window_bounds = array<i64: 384, 128>}, {pipeline_mode = #tpu.pipeline_mode<synchronous>, transform_indices = @transform_6, window_bounds = array<i64: 1, 128>}, {pipeline_mode = #tpu.pipeline_mode<synchronous>, transform_indices = @transform_7, window_bounds = array<i64: 128, 128>}, {pipeline_mode = #tpu.pipeline_mode<synchronous>, transform_indices = @transform_8, window_bounds = array<i64: 1, 128>}, {transform_indices = @transform_9, window_bounds = array<i64: 8, 128>}]} {
    %c0 = arith.constant 0 : index
    %c0_0 = arith.constant 0 : index
    %0 = vector.load %arg1[%c0, %c0_0] : memref<8x1024xbf16, #tpu.memory_space<vmem>>, vector<8x1024xbf16>
    %c0_1 = arith.constant 0 : index
    %c0_2 = arith.constant 0 : index
    %1 = vector.load %arg2[%c0_1, %c0_2] : memref<1024x512xbf16, #tpu.memory_space<vmem>>, vector<1024x512xbf16>
    %cst = arith.constant dense<0.000000e+00> : vector<8x512xf32>
    %2 = tpu.matmul %0, %1, %cst {dimension_numbers = #tpu.dot_dimension_numbers<[1], [0], [0], [1], [0, 0, 1, 1], [], []>} : vector<8x1024xbf16>, vector<1024x512xbf16>, vector<8x512xf32> -> vector<8x512xf32>
    %c0_3 = arith.constant 0 : index
    %c0_4 = arith.constant 0 : index
    %3 = vector.load %arg3[%c0_3, %c0_4] : memref<1x512xf32, #tpu.memory_space<vmem>>, vector<1x512xf32>
    %4 = vector.broadcast %3 : vector<1x512xf32> to vector<8x512xf32>
    %5 = arith.addf %2, %4 : vector<8x512xf32>
    %cst_5 = arith.constant 0.000000e+00 : f32
    %6 = vector.broadcast %cst_5 : f32 to vector<8x512xf32>
    %7 = arith.maximumf %5, %6 : vector<8x512xf32>
    %8 = arith.truncf %7 : vector<8x512xf32> to vector<8x512xbf16>
    %c0_6 = arith.constant 0 : index
    %c0_7 = arith.constant 0 : index
    %9 = vector.load %arg4[%c0_6, %c0_7] : memref<512x384xbf16, #tpu.memory_space<vmem>>, vector<512x384xbf16>
    %cst_8 = arith.constant dense<0.000000e+00> : vector<8x384xf32>
    %10 = tpu.matmul %8, %9, %cst_8 {dimension_numbers = #tpu.dot_dimension_numbers<[1], [0], [0], [1], [0, 0, 1, 1], [], []>} : vector<8x512xbf16>, vector<512x384xbf16>, vector<8x384xf32> -> vector<8x384xf32>
    %c0_9 = arith.constant 0 : index
    %c0_10 = arith.constant 0 : index
    %11 = vector.load %arg5[%c0_9, %c0_10] : memref<1x384xf32, #tpu.memory_space<vmem>>, vector<1x384xf32>
    %12 = vector.broadcast %11 : vector<1x384xf32> to vector<8x384xf32>
    %13 = arith.addf %10, %12 : vector<8x384xf32>
    %cst_11 = arith.constant 0.000000e+00 : f32
    %14 = vector.broadcast %cst_11 : f32 to vector<8x384xf32>
    %15 = arith.maximumf %13, %14 : vector<8x384xf32>
    %16 = arith.truncf %15 : vector<8x384xf32> to vector<8x384xbf16>
    %c0_12 = arith.constant 0 : index
    %c0_13 = arith.constant 0 : index
    %17 = vector.load %arg6[%c0_12, %c0_13] : memref<384x128xbf16, #tpu.memory_space<vmem>>, vector<384x128xbf16>
    %cst_14 = arith.constant dense<0.000000e+00> : vector<8x128xf32>
    %18 = tpu.matmul %16, %17, %cst_14 {dimension_numbers = #tpu.dot_dimension_numbers<[1], [0], [0], [1], [0, 0, 1, 1], [], []>} : vector<8x384xbf16>, vector<384x128xbf16>, vector<8x128xf32> -> vector<8x128xf32>
    %c0_15 = arith.constant 0 : index
    %c0_16 = arith.constant 0 : index
    %19 = vector.load %arg7[%c0_15, %c0_16] : memref<1x128xf32, #tpu.memory_space<vmem>>, vector<1x128xf32>
    %20 = vector.broadcast %19 : vector<1x128xf32> to vector<8x128xf32>
    %21 = arith.addf %18, %20 : vector<8x128xf32>
    %cst_17 = arith.constant 0.000000e+00 : f32
    %22 = vector.broadcast %cst_17 : f32 to vector<8x128xf32>
    %23 = arith.maximumf %21, %22 : vector<8x128xf32>
    %24 = arith.truncf %23 : vector<8x128xf32> to vector<8x128xbf16>
    %c0_18 = arith.constant 0 : index
    %c0_19 = arith.constant 0 : index
    %25 = vector.load %arg8[%c0_18, %c0_19] : memref<128x128xbf16, #tpu.memory_space<vmem>>, vector<128x128xbf16>
    %cst_20 = arith.constant dense<0.000000e+00> : vector<8x128xf32>
    %26 = tpu.matmul %24, %25, %cst_20 {dimension_numbers = #tpu.dot_dimension_numbers<[1], [0], [0], [1], [0, 0, 1, 1], [], []>} : vector<8x128xbf16>, vector<128x128xbf16>, vector<8x128xf32> -> vector<8x128xf32>
    %c0_21 = arith.constant 0 : index
    %c0_22 = arith.constant 0 : index
    %27 = vector.load %arg9[%c0_21, %c0_22] : memref<1x128xf32, #tpu.memory_space<vmem>>, vector<1x128xf32>
    %28 = vector.broadcast %27 : vector<1x128xf32> to vector<8x128xf32>
    %29 = arith.addf %26, %28 : vector<8x128xf32>
    %c0_23 = arith.constant 0 : index
    %c0_24 = arith.constant 0 : index
    %30 = vector.load %arg10[%c0_23, %c0_24] : memref<8x128xf32, #tpu.memory_space<vmem>>, vector<8x128xf32>
    tpu.vector_store %arg10[%c0_23, %c0_24], %29 {strides = array<i32>} : memref<8x128xf32, #tpu.memory_space<vmem>>, vector<8x128xf32>,
    return
  }
  func.func @transform_0(%arg0: i32) -> (i32, i32) {
    %c0_i32 = arith.constant 0 : i32
    %c0_i32_0 = arith.constant 0 : i32
    return %arg0, %c0_i32 : i32, i32
  }
  func.func @transform_1(%arg0: i32) -> (i32, i32) {
    %c0_i32 = arith.constant 0 : i32
    %c0_i32_0 = arith.constant 0 : i32
    %c0_i32_1 = arith.constant 0 : i32
    return %c0_i32, %c0_i32_0 : i32, i32
  }
  func.func @transform_2(%arg0: i32) -> (i32, i32) {
    %c0_i32 = arith.constant 0 : i32
    %c0_i32_0 = arith.constant 0 : i32
    %c0_i32_1 = arith.constant 0 : i32
    return %c0_i32, %c0_i32_0 : i32, i32
  }
  func.func @transform_3(%arg0: i32) -> (i32, i32) {
    %c0_i32 = arith.constant 0 : i32
    %c0_i32_0 = arith.constant 0 : i32
    %c0_i32_1 = arith.constant 0 : i32
    return %c0_i32, %c0_i32_0 : i32, i32
  }
  func.func @transform_4(%arg0: i32) -> (i32, i32) {
    %c0_i32 = arith.constant 0 : i32
    %c0_i32_0 = arith.constant 0 : i32
    %c0_i32_1 = arith.constant 0 : i32
    return %c0_i32, %c0_i32_0 : i32, i32
  }
  func.func @transform_5(%arg0: i32) -> (i32, i32) {
    %c0_i32 = arith.constant 0 : i32
    %c0_i32_0 = arith.constant 0 : i32
    %c0_i32_1 = arith.constant 0 : i32
    return %c0_i32, %c0_i32_0 : i32, i32
  }
  func.func @transform_6(%arg0: i32) -> (i32, i32) {
    %c0_i32 = arith.constant 0 : i32
    %c0_i32_0 = arith.constant 0 : i32
    %c0_i32_1 = arith.constant 0 : i32
    return %c0_i32, %c0_i32_0 : i32, i32
  }
  func.func @transform_7(%arg0: i32) -> (i32, i32) {
    %c0_i32 = arith.constant 0 : i32
    %c0_i32_0 = arith.constant 0 : i32
    %c0_i32_1 = arith.constant 0 : i32
    return %c0_i32, %c0_i32_0 : i32, i32
  }
  func.func @transform_8(%arg0: i32) -> (i32, i32) {
    %c0_i32 = arith.constant 0 : i32
    %c0_i32_0 = arith.constant 0 : i32
    %c0_i32_1 = arith.constant 0 : i32
    return %c0_i32, %c0_i32_0 : i32, i32
  }
  func.func @transform_9(%arg0: i32) -> (i32, i32) {
    %c0_i32 = arith.constant 0 : i32
    %c0_i32_0 = arith.constant 0 : i32
    return %arg0, %c0_i32 : i32, i32
  }
}

</mosaic_0001>

<bundles_post_ra>
// kernel: nn_model_forward.1
= control target key start
LH: loop header
LB: loop body
LE: loop exit
PB: predicated region body
PF: predicated region fallthrough
CT: control target
= control target key end

     0   :  { %14 = vsyncpa [#allocation3], 0  ;;  %s4625_s0 = inlined_call_operand.vmem [shape: bf16[8,1024], index: 0, kind: input, shape index: {}]   ;;  %s4626_s1 = inlined_call_operand.hbm [shape: bf16[1024,512], index: 1, kind: input, shape index: {}]   ;;  %s4627_s2 = inlined_call_operand.vmem [shape: f32[1,512], index: 2, kind: input, shape index: {}]   ;;  %s4628_s3 = inlined_call_operand.hbm [shape: bf16[512,384], index: 3, kind: input, shape index: {}]   ;;  %s4629_s4 = inlined_call_operand.vmem [shape: f32[1,384], index: 4, kind: input, shape index: {}]   ;;  %s4630_s5 = inlined_call_operand.hbm [shape: bf16[384,128], index: 5, kind: input, shape index: {}]   ;;  %s4631_s6 = inlined_call_operand.vmem [shape: f32[1,128], index: 6, kind: input, shape index: {}]   ;;  %s4632_s7 = inlined_call_operand.vmem [shape: bf16[128,128], index: 7, kind: input, shape index: {}]   ;;  %s4633_s8 = inlined_call_operand.vmem [shape: f32[1,128], index: 8, kind: input, shape index: {}]   ;;  %s4634_s9 = inlined_call_operand.hbm [shape: f32[8,128], index: 9, kind: output, shape index: {}]  }
   0x1   :  { %15 = vsyncpa [#allocation6], 0 }
   0x2   :  { %16 = vsyncpa [#allocation4], 0  ;;  %s4403_s30 = smov [#allocation5]  }
   0x3   :  { %s38_s10 = sshll.u32 %s4403_s30, 4  ;;  %s39_s10 = int_to_ptr.vmem [resolvable:$true] %s38_s10 }
   0x4   :  { %s4325_s11 = scalar_lea.vmem %s39_s10, 12288  ;;  %p4330_p1 = scmp.lt.s32.totalorder %s39_s10, %s39_s10 }
   0x5   :  { %p4326_p0 = scmp.ne.s32.totalorder %s39_s10, %s4325_s11  ;;  %p4331_p2 = scmp.lt.s32.totalorder %s4325_s11, %s4325_s11 }
   0x7   :  { %p4332_p3 = por %p4331_p2, %p4330_p1 }
   0x9   :  { %p4333_p4 = pnand %p4332_p3, %p4326_p0 }
   0xb   :  { %4336 = shalt.err (!%p4333_p4)
}
   0xc   :  { %s4404_s12 = smov 192   ;;  %s4405_s13 = smov 12  }
   0xd   :  { %44 = dma.hbm_to_vmem [thread:$0]  %s4628_s3, 12288, %s39_s10, [#allocation6], %s4404_s12, %s4404_s12, %s4405_s13  }
   0xe   :  { %s4406_s16 = smov [#allocation2]  }
   0xf   :  { %s24_s17 = sshll.u32 %s4406_s16, 4  ;;  %s25_s17 = int_to_ptr.vmem [resolvable:$true] %s24_s17 }
  0x10   :  { %s4345_s18 = scalar_lea.vmem %s25_s17, 32768  ;;  %p4350_p6 = scmp.lt.s32.totalorder %s25_s17, %s25_s17 }
  0x11   :  { %p4346_p5 = scmp.ne.s32.totalorder %s25_s17, %s4345_s18  ;;  %p4351_p7 = scmp.lt.s32.totalorder %s4345_s18, %s4345_s18 }
  0x13   :  { %p4352_p8 = por %p4351_p7, %p4350_p6 }
  0x15   :  { %p4353_p9 = pnand %p4352_p8, %p4346_p5 }
  0x17   :  { %4356 = shalt.err (!%p4353_p9)
}
  0x18   :  { %s4407_s19 = smov 256   ;;  %s4408_s20 = smov 16  }
  0x19   :  { %30 = dma.hbm_to_vmem [thread:$0]  %s4626_s1, 32768, %s25_s17, [#allocation3], %s4407_s19, %s4407_s19, %s4408_s20  }
  0x1a   :  { %s4409_s23 = smov [#allocation7]  }
  0x1b   :  { %s52_s24 = sshll.u32 %s4409_s23, 4  ;;  %s53_s24 = int_to_ptr.vmem [resolvable:$true] %s52_s24 }
  0x1c   :  { %s4365_s3 = scalar_lea.vmem %s53_s24, 3072  ;;  %p4370_p11 = scmp.lt.s32.totalorder %s53_s24, %s53_s24 }
  0x1d   :  { %p4366_p10 = scmp.ne.s32.totalorder %s53_s24, %s4365_s3  ;;  %p4371_p12 = scmp.lt.s32.totalorder %s4365_s3, %s4365_s3 }
  0x1f   :  { %p4372_p13 = por %p4371_p12, %p4370_p11 }
  0x21   :  { %p4373_p0 = pnand %p4372_p13, %p4366_p10 }
  0x23   :  { %4376 = shalt.err (!%p4373_p0)
}
  0x24   :  { %s4410_s25 = smov 64   ;;  %s4411_s26 = smov 4  }
  0x25   :  { %58 = dma.hbm_to_vmem [thread:$0]  %s4630_s5, 3072, %s53_s24, [#allocation6], %s4410_s25, %s4410_s25, %s4411_s26  }
  0x26   :  { %4397 = dma.done.wait [#allocation3], 32768  }
  0x27   :  { %4398 = vsyncadd [#allocation3], 4294934528 }
  0x28   :  { %4399 = dma.done.wait [#allocation6], 15360  }
  0x29   :  { %4400 = vsyncadd [#allocation6], 4294951936  ;;  %v3765_v0 = vld [vmem:[#allocation2 + $0xe4] ss:$16 sps:$4 sm:$0xff]   ;;  %v3769_v2 = vld [vmem:[#allocation2 + $0xe0] ss:$16 sps:$4 sm:$0xff]  }
  0x2a   :  { %v3767_v1 = vld [vmem:[#allocation2 + $0x2e4] ss:$16 sps:$4 sm:$0xff]   ;;  %1665 = vmatprep.subr.bf16.mxu0 %v3765_v0  ;;  %v3770_v3 = vld [vmem:[#allocation2 + $0x2e0] ss:$16 sps:$4 sm:$0xff]   ;;  %v76_v48 = vld [vmem:[%s4625_s0 + $0x8] sm:$0xff]  ;;  %vm4413_vm0 = vmmov 0  }
  0x2b   :  { %1706 = vmatprep.subr.bf16.mxu1 %v3767_v1  ;;  %v3771_v4 = vld [vmem:[#allocation2 + $0xc4] ss:$16 sps:$4 sm:$0xff]   ;;  %1666 = vmatpush1.bf16.msra.mxu0 %v3769_v2  ;;  %v3775_v6 = vld [vmem:[#allocation2 + $0xc0] ss:$16 sps:$4 sm:$0xff]   ;;  %v4482_v51 = vcombine.high %v76_v48, %v76_v48  ;;  %s4414_s10 = smov [#allocation8]  }
  0x2c   :  { %1707 = vmatpush1.bf16.msra.mxu1 %v3770_v3  ;;  %v3773_v5 = vld [vmem:[#allocation2 + $0x2c4] ss:$16 sps:$4 sm:$0xff]   ;;  %1667 = vmatprep.subr.bf16.mxu0 %v3771_v4  ;;  %v3776_v7 = vld [vmem:[#allocation2 + $0x2c0] ss:$16 sps:$4 sm:$0xff]   ;;  %s3225_s11 = sshll.u32 %s4414_s10, 4  ;;  %s3226_s11 = int_to_ptr.vmem [resolvable:$true] %s3225_s11 }
  0x2d   :  { %1708 = vmatprep.subr.bf16.mxu1 %v3773_v5  ;;  %v3777_v8 = vld [vmem:[#allocation2 + $0xa4] ss:$16 sps:$4 sm:$0xff]   ;;  %v3781_v10 = vld [vmem:[#allocation2 + $0xa0] ss:$16 sps:$4 sm:$0xff]   ;;  %1738 = vmatprep.mubr.bf16.mxu1 %v4482_v51  ;;  %p4382_p2 = scmp.lt.s32.totalorder %s3226_s11, %s3226_s11 }
  0x2e   :  { %v3779_v9 = vld [vmem:[#allocation2 + $0x2a4] ss:$16 sps:$4 sm:$0xff]   ;;  %v3782_v11 = vld [vmem:[#allocation2 + $0x2a0] ss:$16 sps:$4 sm:$0xff]  }
  0x2f   :  { %1668 = vmatpush1.bf16.msra.mxu0 %v3775_v6  ;;  %v3783_v12 = vld [vmem:[#allocation2 + $0x84] ss:$16 sps:$4 sm:$0xff]   ;;  %v3787_v14 = vld [vmem:[#allocation2 + $0x80] ss:$16 sps:$4 sm:$0xff]  }
  0x30   :  { %1709 = vmatpush1.bf16.msra.mxu1 %v3776_v7  ;;  %1669 = vmatprep.subr.bf16.mxu0 %v3777_v8  ;;  %v3785_v13 = vld [vmem:[#allocation2 + $0x284] ss:$16 sps:$4 sm:$0xff]   ;;  %v3788_v15 = vld [vmem:[#allocation2 + $0x280] ss:$16 sps:$4 sm:$0xff]   ;;  %v4488_v7 = vcombine.low %v76_v48, %v76_v48 }
  0x31   :  { %1710 = vmatprep.subr.bf16.mxu1 %v3779_v9  ;;  %v3789_v16 = vld [vmem:[#allocation2 + $0x64] ss:$16 sps:$4 sm:$0xff]   ;;  %v3793_v18 = vld [vmem:[#allocation2 + $0x60] ss:$16 sps:$4 sm:$0xff]  }
  0x32   :  { %v3791_v17 = vld [vmem:[#allocation2 + $0x264] ss:$16 sps:$4 sm:$0xff]   ;;  %v3794_v19 = vld [vmem:[#allocation2 + $0x260] ss:$16 sps:$4 sm:$0xff]  }
  0x33   :  { %1670 = vmatpush1.bf16.msra.mxu0 %v3781_v10  ;;  %v3795_v20 = vld [vmem:[#allocation2 + $0x44] ss:$16 sps:$4 sm:$0xff]   ;;  %v3799_v22 = vld [vmem:[#allocation2 + $0x40] ss:$16 sps:$4 sm:$0xff]  }
  0x34   :  { %1711 = vmatpush1.bf16.msra.mxu1 %v3782_v11  ;;  %1671 = vmatprep.subr.bf16.mxu0 %v3783_v12  ;;  %v3797_v21 = vld [vmem:[#allocation2 + $0x244] ss:$16 sps:$4 sm:$0xff]   ;;  %v3800_v23 = vld [vmem:[#allocation2 + $0x240] ss:$16 sps:$4 sm:$0xff]  }
  0x35   :  { %1712 = vmatprep.subr.bf16.mxu1 %v3785_v13  ;;  %v3801_v24 = vld [vmem:[#allocation2 + $0x24] ss:$16 sps:$4 sm:$0xff]   ;;  %v3805_v26 = vld [vmem:[#allocation2 + $0x20] ss:$16 sps:$4 sm:$0xff]  }
  0x36   :  { %v3803_v25 = vld [vmem:[#allocation2 + $0x224] ss:$16 sps:$4 sm:$0xff]   ;;  %v3806_v27 = vld [vmem:[#allocation2 + $0x220] ss:$16 sps:$4 sm:$0xff]  }
  0x37   :  { %1672 = vmatpush1.bf16.msra.mxu0 %v3787_v14  ;;  %v3807_v28 = vld [vmem:[#allocation2 + $0x4] ss:$16 sps:$4 sm:$0xff]   ;;  %v3811_v30 = vld [vmem:[#allocation2] ss:$16 sps:$4 sm:$0xff]  }
  0x38   :  { %1713 = vmatpush1.bf16.msra.mxu1 %v3788_v15  ;;  %1673 = vmatprep.subr.bf16.mxu0 %v3789_v16  ;;  %v3809_v29 = vld [vmem:[#allocation2 + $0x204] ss:$16 sps:$4 sm:$0xff]   ;;  %v3812_v31 = vld [vmem:[#allocation2 + $0x200] ss:$16 sps:$4 sm:$0xff]  }
  0x39   :  { %1714 = vmatprep.subr.bf16.mxu1 %v3791_v17  ;;  %v3813_v32 = vld [vmem:[#allocation2 + $0x1e4] ss:$16 sps:$4 sm:$0xff]   ;;  %v3817_v34 = vld [vmem:[#allocation2 + $0x1e0] ss:$16 sps:$4 sm:$0xff]  }
  0x3a   :  { %v3815_v33 = vld [vmem:[#allocation2 + $0x3e4] ss:$16 sps:$4 sm:$0xff]   ;;  %v3818_v35 = vld [vmem:[#allocation2 + $0x3e0] ss:$16 sps:$4 sm:$0xff]  }
  0x3b   :  { %1674 = vmatpush1.bf16.msra.mxu0 %v3793_v18  ;;  %v3819_v36 = vld [vmem:[#allocation2 + $0x1c4] ss:$16 sps:$4 sm:$0xff]   ;;  %v3823_v38 = vld [vmem:[#allocation2 + $0x1c0] ss:$16 sps:$4 sm:$0xff]  }
  0x3c   :  { %1715 = vmatpush1.bf16.msra.mxu1 %v3794_v19  ;;  %1675 = vmatprep.subr.bf16.mxu0 %v3795_v20  ;;  %v3821_v37 = vld [vmem:[#allocation2 + $0x3c4] ss:$16 sps:$4 sm:$0xff]   ;;  %v3824_v39 = vld [vmem:[#allocation2 + $0x3c0] ss:$16 sps:$4 sm:$0xff]  }
  0x3d   :  { %1716 = vmatprep.subr.bf16.mxu1 %v3797_v21  ;;  %v3825_v40 = vld [vmem:[#allocation2 + $0x1a4] ss:$16 sps:$4 sm:$0xff]   ;;  %v3829_v42 = vld [vmem:[#allocation2 + $0x1a0] ss:$16 sps:$4 sm:$0xff]  }
  0x3e   :  { %v3827_v41 = vld [vmem:[#allocation2 + $0x3a4] ss:$16 sps:$4 sm:$0xff]   ;;  %v3830_v43 = vld [vmem:[#allocation2 + $0x3a0] ss:$16 sps:$4 sm:$0xff]  }
  0x3f   :  { %1676 = vmatpush1.bf16.msra.mxu0 %v3799_v22  ;;  %v3831_v44 = vld [vmem:[#allocation2 + $0x184] ss:$16 sps:$4 sm:$0xff]   ;;  %v3835_v49 = vld [vmem:[#allocation2 + $0x180] ss:$16 sps:$4 sm:$0xff]  }
  0x40   :  { %1717 = vmatpush1.bf16.msra.mxu1 %v3800_v23  ;;  %1677 = vmatprep.subr.bf16.mxu0 %v3801_v24  ;;  %v3833_v45 = vld [vmem:[#allocation2 + $0x384] ss:$16 sps:$4 sm:$0xff]   ;;  %v3836_v50 = vld [vmem:[#allocation2 + $0x380] ss:$16 sps:$4 sm:$0xff]  }
  0x41   :  { %1718 = vmatprep.subr.bf16.mxu1 %v3803_v25  ;;  %v75_v46 = vld [vmem:[%s4625_s0] sm:$0xff] }
  0x42   :  { %v4477_v47 = vcombine.high %v75_v46, %v75_v46  ;;  %v3837_v52 = vld [vmem:[#allocation2 + $0x164] ss:$16 sps:$4 sm:$0xff]   ;;  %v3841_v54 = vld [vmem:[#allocation2 + $0x160] ss:$16 sps:$4 sm:$0xff]   ;;  %v4486_v6 = vcombine.low %v75_v46, %v75_v46 }
  0x43   :  { %1678 = vmatpush1.bf16.msra.mxu0 %v3805_v26  ;;  %v3839_v53 = vld [vmem:[#allocation2 + $0x364] ss:$16 sps:$4 sm:$0xff]   ;;  %v3842_v55 = vld [vmem:[#allocation2 + $0x360] ss:$16 sps:$4 sm:$0xff]  }
  0x44   :  { %1719 = vmatpush1.bf16.msra.mxu1 %v3806_v27  ;;  %1679 = vmatprep.subr.bf16.mxu0 %v3807_v28  ;;  %v3843_v56 = vld [vmem:[#allocation2 + $0x144] ss:$16 sps:$4 sm:$0xff]   ;;  %v3847_v58 = vld [vmem:[#allocation2 + $0x140] ss:$16 sps:$4 sm:$0xff]  }
  0x45   :  { %1720 = vmatprep.subr.bf16.mxu1 %v3809_v29  ;;  %1697 = vmatprep.mubr.bf16.mxu0 %v4477_v47  ;;  %v3845_v57 = vld [vmem:[#allocation2 + $0x344] ss:$16 sps:$4 sm:$0xff]   ;;  %v3848_v59 = vld [vmem:[#allocation2 + $0x340] ss:$16 sps:$4 sm:$0xff]  }
  0x46   :  { %v3849_v60 = vld [vmem:[#allocation2 + $0x124] ss:$16 sps:$4 sm:$0xff]   ;;  %v3853_v62 = vld [vmem:[#allocation2 + $0x120] ss:$16 sps:$4 sm:$0xff]  }
  0x47   :  { %1680 = vmatpush1.bf16.msra.mxu0 %v3811_v30  ;;  %v3851_v61 = vld [vmem:[#allocation2 + $0x324] ss:$16 sps:$4 sm:$0xff]   ;;  %v3854_v63 = vld [vmem:[#allocation2 + $0x320] ss:$16 sps:$4 sm:$0xff]  }
  0x48   :  { %1721 = vmatpush1.bf16.msra.mxu1 %v3812_v31  ;;  %1681 = vmatprep.subr.bf16.mxu0 %v3813_v32  ;;  %v3855_v0 = vld [vmem:[#allocation2 + $0x104] ss:$16 sps:$4 sm:$0xff]   ;;  %v3859_v2 = vld [vmem:[#allocation2 + $0x100] ss:$16 sps:$4 sm:$0xff]  }
  0x49   :  { %1722 = vmatprep.subr.bf16.mxu1 %v3815_v33  ;;  %v3857_v1 = vld [vmem:[#allocation2 + $0x304] ss:$16 sps:$4 sm:$0xff]   ;;  %v3860_v3 = vld [vmem:[#allocation2 + $0x300] ss:$16 sps:$4 sm:$0xff]   ;;  %v4500_v33 = vld [vmem:[%s4625_s0 + $0x18] sm:$0xff] }
  0x4a   :  { %v3867_v4 = vld [vmem:[#allocation2 + $0x4e4] ss:$16 sps:$4 sm:$0xff]   ;;  %v3865_v8 = vld [vmem:[#allocation2 + $0x4e0] ss:$16 sps:$4 sm:$0xff]  }
  0x4b   :  { %1682 = vmatpush2.bf16.msra.mxu0 %v3817_v34  ;;  %v3870_v5 = vld [vmem:[#allocation2 + $0x6e4] ss:$16 sps:$4 sm:$0xff]   ;;  %v3868_v9 = vld [vmem:[#allocation2 + $0x6e0] ss:$16 sps:$4 sm:$0xff]  }
  0x4c   :  { %1723 = vmatpush2.bf16.msra.mxu1 %v3818_v35  ;;  %1683 = vmatprep.subr.bf16.mxu0 %v3819_v36  ;;  %v3873_v10 = vld [vmem:[#allocation2 + $0x4c4] ss:$16 sps:$4 sm:$0xff]   ;;  %v3871_v12 = vld [vmem:[#allocation2 + $0x4c0] ss:$16 sps:$4 sm:$0xff]  }
  0x4d   :  { %1724 = vmatprep.subr.bf16.mxu1 %v3821_v37  ;;  %v3876_v11 = vld [vmem:[#allocation2 + $0x6c4] ss:$16 sps:$4 sm:$0xff]   ;;  %v3874_v13 = vld [vmem:[#allocation2 + $0x6c0] ss:$16 sps:$4 sm:$0xff]   ;;  %v4508_v37 = vcombine.high %v4500_v33, %v4500_v33 }
  0x4e   :  { %v3879_v14 = vld [vmem:[#allocation2 + $0x4a4] ss:$16 sps:$4 sm:$0xff]   ;;  %v3877_v16 = vld [vmem:[#allocation2 + $0x4a0] ss:$16 sps:$4 sm:$0xff]  }
  0x4f   :  { %1684 = vmatpush2.bf16.msra.mxu0 %v3823_v38  ;;  %v3882_v15 = vld [vmem:[#allocation2 + $0x6a4] ss:$16 sps:$4 sm:$0xff]   ;;  %v3880_v17 = vld [vmem:[#allocation2 + $0x6a0] ss:$16 sps:$4 sm:$0xff]  }
  0x50   :  { %1725 = vmatpush2.bf16.msra.mxu1 %v3824_v39  ;;  %1685 = vmatprep.subr.bf16.mxu0 %v3825_v40  ;;  %v3885_v18 = vld [vmem:[#allocation2 + $0x484] ss:$16 sps:$4 sm:$0xff]   ;;  %v3883_v20 = vld [vmem:[#allocation2 + $0x480] ss:$16 sps:$4 sm:$0xff]  }
  0x51   :  { %1726 = vmatprep.subr.bf16.mxu1 %v3827_v41  ;;  %v3888_v19 = vld [vmem:[#allocation2 + $0x684] ss:$16 sps:$4 sm:$0xff]   ;;  %v3886_v21 = vld [vmem:[#allocation2 + $0x680] ss:$16 sps:$4 sm:$0xff]  }
  0x52   :  { %v3891_v22 = vld [vmem:[#allocation2 + $0x464] ss:$16 sps:$4 sm:$0xff]   ;;  %v3889_v24 = vld [vmem:[#allocation2 + $0x460] ss:$16 sps:$4 sm:$0xff]  }
  0x53   :  { %1686 = vmatpush2.bf16.msra.mxu0 %v3829_v42  ;;  %v3894_v23 = vld [vmem:[#allocation2 + $0x664] ss:$16 sps:$4 sm:$0xff]   ;;  %v3892_v25 = vld [vmem:[#allocation2 + $0x660] ss:$16 sps:$4 sm:$0xff]  }
  0x54   :  { %1727 = vmatpush2.bf16.msra.mxu1 %v3830_v43  ;;  %1687 = vmatprep.subr.bf16.mxu0 %v3831_v44  ;;  %v3897_v26 = vld [vmem:[#allocation2 + $0x444] ss:$16 sps:$4 sm:$0xff]   ;;  %v3895_v28 = vld [vmem:[#allocation2 + $0x440] ss:$16 sps:$4 sm:$0xff]  }
  0x55   :  { %1728 = vmatprep.subr.bf16.mxu1 %v3833_v45  ;;  %v3900_v27 = vld [vmem:[#allocation2 + $0x644] ss:$16 sps:$4 sm:$0xff]   ;;  %v3898_v29 = vld [vmem:[#allocation2 + $0x640] ss:$16 sps:$4 sm:$0xff]  }
  0x56   :  { %v3903_v30 = vld [vmem:[#allocation2 + $0x424] ss:$16 sps:$4 sm:$0xff]   ;;  %v3901_v34 = vld [vmem:[#allocation2 + $0x420] ss:$16 sps:$4 sm:$0xff]  }
  0x57   :  { %1688 = vmatpush2.bf16.msra.mxu0 %v3835_v49  ;;  %v3906_v31 = vld [vmem:[#allocation2 + $0x624] ss:$16 sps:$4 sm:$0xff]   ;;  %v3904_v35 = vld [vmem:[#allocation2 + $0x620] ss:$16 sps:$4 sm:$0xff]  }
  0x58   :  { %1729 = vmatpush2.bf16.msra.mxu1 %v3836_v50  ;;  %1689 = vmatprep.subr.bf16.mxu0 %v3837_v52  ;;  %v4495_v32 = vld [vmem:[%s4625_s0 + $0x10] sm:$0xff] }
  0x59   :  { %1730 = vmatprep.subr.bf16.mxu1 %v3839_v53  ;;  %v4504_v36 = vcombine.high %v4495_v32, %v4495_v32  ;;  %v3909_v38 = vld [vmem:[#allocation2 + $0x404] ss:$16 sps:$4 sm:$0xff]   ;;  %v3907_v40 = vld [vmem:[#allocation2 + $0x400] ss:$16 sps:$4 sm:$0xff]  }
  0x5a   :  { %v3912_v39 = vld [vmem:[#allocation2 + $0x604] ss:$16 sps:$4 sm:$0xff]   ;;  %v3910_v41 = vld [vmem:[#allocation2 + $0x600] ss:$16 sps:$4 sm:$0xff]  }
  0x5b   :  { %1690 = vmatpush2.bf16.msra.mxu0 %v3841_v54  ;;  %v3915_v42 = vld [vmem:[#allocation2 + $0x5e4] ss:$16 sps:$4 sm:$0xff]   ;;  %v3913_v44 = vld [vmem:[#allocation2 + $0x5e0] ss:$16 sps:$4 sm:$0xff]  }
  0x5c   :  { %1731 = vmatpush2.bf16.msra.mxu1 %v3842_v55  ;;  %1691 = vmatprep.subr.bf16.mxu0 %v3843_v56  ;;  %v3918_v43 = vld [vmem:[#allocation2 + $0x7e4] ss:$16 sps:$4 sm:$0xff]   ;;  %v3916_v45 = vld [vmem:[#allocation2 + $0x7e0] ss:$16 sps:$4 sm:$0xff]  }
  0x5d   :  { %1732 = vmatprep.subr.bf16.mxu1 %v3845_v57  ;;  %v3921_v46 = vld [vmem:[#allocation2 + $0x5c4] ss:$16 sps:$4 sm:$0xff]   ;;  %v3919_v49 = vld [vmem:[#allocation2 + $0x5c0] ss:$16 sps:$4 sm:$0xff]  }
  0x5e   :  { %v3924_v48 = vld [vmem:[#allocation2 + $0x7c4] ss:$16 sps:$4 sm:$0xff]   ;;  %v3922_v50 = vld [vmem:[#allocation2 + $0x7c0] ss:$16 sps:$4 sm:$0xff]  }
  0x5f   :  { %1692 = vmatpush2.bf16.msra.mxu0 %v3847_v58  ;;  %v3927_v52 = vld [vmem:[#allocation2 + $0x5a4] ss:$16 sps:$4 sm:$0xff]   ;;  %v3925_v54 = vld [vmem:[#allocation2 + $0x5a0] ss:$16 sps:$4 sm:$0xff]  }
  0x60   :  { %1733 = vmatpush2.bf16.msra.mxu1 %v3848_v59  ;;  %1693 = vmatprep.subr.bf16.mxu0 %v3849_v60  ;;  %v3930_v53 = vld [vmem:[#allocation2 + $0x7a4] ss:$16 sps:$4 sm:$0xff]   ;;  %v3928_v55 = vld [vmem:[#allocation2 + $0x7a0] ss:$16 sps:$4 sm:$0xff]  }
  0x61   :  { %1734 = vmatprep.subr.bf16.mxu1 %v3851_v61  ;;  %v3933_v56 = vld [vmem:[#allocation2 + $0x584] ss:$16 sps:$4 sm:$0xff]   ;;  %v3931_v58 = vld [vmem:[#allocation2 + $0x580] ss:$16 sps:$4 sm:$0xff]  }
  0x62   :  { %v3936_v57 = vld [vmem:[#allocation2 + $0x784] ss:$16 sps:$4 sm:$0xff]   ;;  %v3934_v59 = vld [vmem:[#allocation2 + $0x780] ss:$16 sps:$4 sm:$0xff]  }
  0x63   :  { %1694 = vmatpush2.bf16.msra.mxu0 %v3853_v62  ;;  %v3939_v60 = vld [vmem:[#allocation2 + $0x564] ss:$16 sps:$4 sm:$0xff]   ;;  %v3937_v62 = vld [vmem:[#allocation2 + $0x560] ss:$16 sps:$4 sm:$0xff]  }
  0x64   :  { %1735 = vmatpush2.bf16.msra.mxu1 %v3854_v63  ;;  %1695 = vmatprep.subr.bf16.mxu0 %v3855_v0  ;;  %v3942_v61 = vld [vmem:[#allocation2 + $0x764] ss:$16 sps:$4 sm:$0xff]   ;;  %v3940_v63 = vld [vmem:[#allocation2 + $0x760] ss:$16 sps:$4 sm:$0xff]  }
  0x65   :  { %1736 = vmatprep.subr.bf16.mxu1 %v3857_v1  ;;  %v3945_v0 = vld [vmem:[#allocation2 + $0x544] ss:$16 sps:$4 sm:$0xff]  }
  0x66   :  { %v3948_v1 = vld [vmem:[#allocation2 + $0x744] ss:$16 sps:$4 sm:$0xff]  }
  0x67   :  { %1696 = vmatpush2.bf16.msra.mxu0 %v3859_v2  ;;  %v3943_v2 = vld [vmem:[#allocation2 + $0x540] ss:$16 sps:$4 sm:$0xff]  }
  0x68   :  { %1737 = vmatpush2.bf16.msra.mxu1 %v3860_v3  ;;  %1747 = vmatprep.subr.bf16.mxu0 %v3867_v4  ;;  %v3946_v3 = vld [vmem:[#allocation2 + $0x740] ss:$16 sps:$4 sm:$0xff]   ;;  %v3951_v4 = vld [vmem:[#allocation2 + $0x524] ss:$16 sps:$4 sm:$0xff]  }
  0x69   :  { %1788 = vmatprep.subr.bf16.mxu1 %v3870_v5  ;;  %v3954_v5 = vld [vmem:[#allocation2 + $0x724] ss:$16 sps:$4 sm:$0xff]  }
  0x6a   :  { %1698 = vmatmul.mubr.bf16.vlgmr.msra.gmra.mxu0 %v4486_v6 }
  0x6b   :  { %1739 = vmatmul.mubr.bf16.vlgmr.msra.gmra.mxu1 %v4488_v7  ;;  %1748 = vmatpush1.bf16.msra.mxu0 %v3865_v8  ;;  %v3949_v8 = vld [vmem:[#allocation2 + $0x520] ss:$16 sps:$4 sm:$0xff]  }
  0x6c   :  { %1789 = vmatpush1.bf16.msra.mxu1 %v3868_v9  ;;  %1749 = vmatprep.subr.bf16.mxu0 %v3873_v10  ;;  %v3952_v9 = vld [vmem:[#allocation2 + $0x720] ss:$16 sps:$4 sm:$0xff]   ;;  %v3957_v10 = vld [vmem:[#allocation2 + $0x504] ss:$16 sps:$4 sm:$0xff]  }
  0x6d   :  { %1790 = vmatprep.subr.bf16.mxu1 %v3876_v11  ;;  %1779 = vmatprep.mubr.bf16.mxu0 %v4504_v36  ;;  %v3960_v11 = vld [vmem:[#allocation2 + $0x704] ss:$16 sps:$4 sm:$0xff]  }
  0x6e   :  { %1820 = vmatprep.mubr.bf16.mxu1 %v4508_v37 }
  0x6f   :  { %1750 = vmatpush1.bf16.msra.mxu0 %v3871_v12  ;;  %v3955_v12 = vld [vmem:[#allocation2 + $0x500] ss:$16 sps:$4 sm:$0xff]  }
  0x70   :  { %1791 = vmatpush1.bf16.msra.mxu1 %v3874_v13  ;;  %1751 = vmatprep.subr.bf16.mxu0 %v3879_v14  ;;  %v3958_v13 = vld [vmem:[#allocation2 + $0x700] ss:$16 sps:$4 sm:$0xff]   ;;  %v3967_v14 = vld [vmem:[#allocation2 + $0xec] ss:$16 sps:$4 sm:$0xff]  }
  0x71   :  { %1792 = vmatprep.subr.bf16.mxu1 %v3882_v15  ;;  %v3970_v15 = vld [vmem:[#allocation2 + $0x2ec] ss:$16 sps:$4 sm:$0xff]  }
  0x73   :  { %1752 = vmatpush1.bf16.msra.mxu0 %v3877_v16  ;;  %v4514_v16 = vcombine.low %v4495_v32, %v4495_v32  ;;  %v3991_v32 = vld [vmem:[#allocation2 + $0x6c] ss:$16 sps:$4 sm:$0xff]  }
  0x74   :  { %1793 = vmatpush1.bf16.msra.mxu1 %v3880_v17  ;;  %1753 = vmatprep.subr.bf16.mxu0 %v3885_v18  ;;  %v4518_v17 = vcombine.low %v4500_v33, %v4500_v33  ;;  %v3965_v18 = vld [vmem:[#allocation2 + $0xe8] ss:$16 sps:$4 sm:$0xff]   ;;  %v3994_v33 = vld [vmem:[#allocation2 + $0x26c] ss:$16 sps:$4 sm:$0xff]  }
  0x75   :  { %1794 = vmatprep.subr.bf16.mxu1 %v3888_v19  ;;  %v3968_v19 = vld [vmem:[#allocation2 + $0x2e8] ss:$16 sps:$4 sm:$0xff]  }
  0x77   :  { %1754 = vmatpush1.bf16.msra.mxu0 %v3883_v20  ;;  %v3973_v20 = vld [vmem:[#allocation2 + $0xcc] ss:$16 sps:$4 sm:$0xff]  }
  0x78   :  { %1795 = vmatpush1.bf16.msra.mxu1 %v3886_v21  ;;  %1755 = vmatprep.subr.bf16.mxu0 %v3891_v22  ;;  %v3976_v21 = vld [vmem:[#allocation2 + $0x2cc] ss:$16 sps:$4 sm:$0xff]   ;;  %v3971_v22 = vld [vmem:[#allocation2 + $0xc8] ss:$16 sps:$4 sm:$0xff]  }
  0x79   :  { %1796 = vmatprep.subr.bf16.mxu1 %v3894_v23  ;;  %v3974_v23 = vld [vmem:[#allocation2 + $0x2c8] ss:$16 sps:$4 sm:$0xff]  }
  0x7b   :  { %1756 = vmatpush1.bf16.msra.mxu0 %v3889_v24  ;;  %v3979_v24 = vld [vmem:[#allocation2 + $0xac] ss:$16 sps:$4 sm:$0xff]  }
  0x7c   :  { %1797 = vmatpush1.bf16.msra.mxu1 %v3892_v25  ;;  %1757 = vmatprep.subr.bf16.mxu0 %v3897_v26  ;;  %v3982_v25 = vld [vmem:[#allocation2 + $0x2ac] ss:$16 sps:$4 sm:$0xff]   ;;  %v3977_v26 = vld [vmem:[#allocation2 + $0xa8] ss:$16 sps:$4 sm:$0xff]  }
  0x7d   :  { %1798 = vmatprep.subr.bf16.mxu1 %v3900_v27  ;;  %v3980_v27 = vld [vmem:[#allocation2 + $0x2a8] ss:$16 sps:$4 sm:$0xff]  }
  0x7f   :  { %1758 = vmatpush1.bf16.msra.mxu0 %v3895_v28  ;;  %v3985_v28 = vld [vmem:[#allocation2 + $0x8c] ss:$16 sps:$4 sm:$0xff]  }
  0x80   :  { %1799 = vmatpush1.bf16.msra.mxu1 %v3898_v29  ;;  %1759 = vmatprep.subr.bf16.mxu0 %v3903_v30  ;;  %v3988_v29 = vld [vmem:[#allocation2 + $0x28c] ss:$16 sps:$4 sm:$0xff]   ;;  %v3983_v30 = vld [vmem:[#allocation2 + $0x88] ss:$16 sps:$4 sm:$0xff]  }
  0x81   :  { %1800 = vmatprep.subr.bf16.mxu1 %v3906_v31  ;;  %v3986_v31 = vld [vmem:[#allocation2 + $0x288] ss:$16 sps:$4 sm:$0xff]  }
  0x83   :  { %1760 = vmatpush1.bf16.msra.mxu0 %v3901_v34  ;;  %v3989_v34 = vld [vmem:[#allocation2 + $0x68] ss:$16 sps:$4 sm:$0xff]  }
  0x84   :  { %1801 = vmatpush1.bf16.msra.mxu1 %v3904_v35  ;;  %1761 = vmatprep.subr.bf16.mxu0 %v3909_v38  ;;  %v4000_v35 = vld [vmem:[#allocation2 + $0x24c] ss:$16 sps:$4 sm:$0xff]   ;;  %v3995_v38 = vld [vmem:[#allocation2 + $0x48] ss:$16 sps:$4 sm:$0xff]  }
  0x85   :  { %1802 = vmatprep.subr.bf16.mxu1 %v3912_v39  ;;  %v3998_v39 = vld [vmem:[#allocation2 + $0x248] ss:$16 sps:$4 sm:$0xff]  }
  0x87   :  { %1762 = vmatpush1.bf16.msra.mxu0 %v3907_v40  ;;  %v4003_v40 = vld [vmem:[#allocation2 + $0x2c] ss:$16 sps:$4 sm:$0xff]  }
  0x88   :  { %1803 = vmatpush1.bf16.msra.mxu1 %v3910_v41  ;;  %1763 = vmatprep.subr.bf16.mxu0 %v3915_v42  ;;  %v4006_v41 = vld [vmem:[#allocation2 + $0x22c] ss:$16 sps:$4 sm:$0xff]   ;;  %v4001_v42 = vld [vmem:[#allocation2 + $0x28] ss:$16 sps:$4 sm:$0xff]  }
  0x89   :  { %1804 = vmatprep.subr.bf16.mxu1 %v3918_v43  ;;  %v4004_v43 = vld [vmem:[#allocation2 + $0x228] ss:$16 sps:$4 sm:$0xff]  }
  0x8b   :  { %1764 = vmatpush2.bf16.msra.mxu0 %v3913_v44  ;;  %v4009_v44 = vld [vmem:[#allocation2 + $0xc] ss:$16 sps:$4 sm:$0xff]  }
  0x8c   :  { %1805 = vmatpush2.bf16.msra.mxu1 %v3916_v45  ;;  %1765 = vmatprep.subr.bf16.mxu0 %v3921_v46  ;;  %v4012_v45 = vld [vmem:[#allocation2 + $0x20c] ss:$16 sps:$4 sm:$0xff]   ;;  %v4007_v46 = vld [vmem:[#allocation2 + $0x8] ss:$16 sps:$4 sm:$0xff]  }
  0x8d   :  { %1806 = vmatprep.subr.bf16.mxu1 %v3924_v48  ;;  %v4010_v48 = vld [vmem:[#allocation2 + $0x208] ss:$16 sps:$4 sm:$0xff]  }
  0x8f   :  { %1766 = vmatpush2.bf16.msra.mxu0 %v3919_v49  ;;  %v4015_v49 = vld [vmem:[#allocation2 + $0x1ec] ss:$16 sps:$4 sm:$0xff]  }
  0x90   :  { %1807 = vmatpush2.bf16.msra.mxu1 %v3922_v50  ;;  %1767 = vmatprep.subr.bf16.mxu0 %v3927_v52  ;;  %v4018_v50 = vld [vmem:[#allocation2 + $0x3ec] ss:$16 sps:$4 sm:$0xff]   ;;  %v4013_v52 = vld [vmem:[#allocation2 + $0x1e8] ss:$16 sps:$4 sm:$0xff]  }
  0x91   :  { %1808 = vmatprep.subr.bf16.mxu1 %v3930_v53  ;;  %v4016_v53 = vld [vmem:[#allocation2 + $0x3e8] ss:$16 sps:$4 sm:$0xff]  }
  0x93   :  { %1768 = vmatpush2.bf16.msra.mxu0 %v3925_v54  ;;  %v4021_v54 = vld [vmem:[#allocation2 + $0x1cc] ss:$16 sps:$4 sm:$0xff]  }
  0x94   :  { %1809 = vmatpush2.bf16.msra.mxu1 %v3928_v55  ;;  %1769 = vmatprep.subr.bf16.mxu0 %v3933_v56  ;;  %v4024_v55 = vld [vmem:[#allocation2 + $0x3cc] ss:$16 sps:$4 sm:$0xff]   ;;  %v4019_v56 = vld [vmem:[#allocation2 + $0x1c8] ss:$16 sps:$4 sm:$0xff]  }
  0x95   :  { %1810 = vmatprep.subr.bf16.mxu1 %v3936_v57  ;;  %v4022_v57 = vld [vmem:[#allocation2 + $0x3c8] ss:$16 sps:$4 sm:$0xff]  }
  0x97   :  { %1770 = vmatpush2.bf16.msra.mxu0 %v3931_v58  ;;  %v4027_v58 = vld [vmem:[#allocation2 + $0x1ac] ss:$16 sps:$4 sm:$0xff]  }
  0x98   :  { %1811 = vmatpush2.bf16.msra.mxu1 %v3934_v59  ;;  %1771 = vmatprep.subr.bf16.mxu0 %v3939_v60  ;;  %v4030_v59 = vld [vmem:[#allocation2 + $0x3ac] ss:$16 sps:$4 sm:$0xff]   ;;  %v4025_v60 = vld [vmem:[#allocation2 + $0x1a8] ss:$16 sps:$4 sm:$0xff]  }
  0x99   :  { %1812 = vmatprep.subr.bf16.mxu1 %v3942_v61  ;;  %v4028_v61 = vld [vmem:[#allocation2 + $0x3a8] ss:$16 sps:$4 sm:$0xff]  }
  0x9b   :  { %1772 = vmatpush2.bf16.msra.mxu0 %v3937_v62  ;;  %v4033_v62 = vld [vmem:[#allocation2 + $0x18c] ss:$16 sps:$4 sm:$0xff]  }
  0x9c   :  { %1813 = vmatpush2.bf16.msra.mxu1 %v3940_v63  ;;  %1773 = vmatprep.subr.bf16.mxu0 %v3945_v0  ;;  %v4036_v63 = vld [vmem:[#allocation2 + $0x38c] ss:$16 sps:$4 sm:$0xff]   ;;  %v4031_v0 = vld [vmem:[#allocation2 + $0x188] ss:$16 sps:$4 sm:$0xff]  }
  0x9d   :  { %1814 = vmatprep.subr.bf16.mxu1 %v3948_v1  ;;  %v4034_v1 = vld [vmem:[#allocation2 + $0x388] ss:$16 sps:$4 sm:$0xff]  }
  0x9f   :  { %1774 = vmatpush2.bf16.msra.mxu0 %v3943_v2  ;;  %v4039_v2 = vld [vmem:[#allocation2 + $0x16c] ss:$16 sps:$4 sm:$0xff]  }
  0xa0   :  { %1815 = vmatpush2.bf16.msra.mxu1 %v3946_v3  ;;  %1775 = vmatprep.subr.bf16.mxu0 %v3951_v4  ;;  %v4042_v3 = vld [vmem:[#allocation2 + $0x36c] ss:$16 sps:$4 sm:$0xff]   ;;  %v4037_v4 = vld [vmem:[#allocation2 + $0x168] ss:$16 sps:$4 sm:$0xff]  }
  0xa1   :  { %1816 = vmatprep.subr.bf16.mxu1 %v3954_v5  ;;  %v4040_v5 = vld [vmem:[#allocation2 + $0x368] ss:$16 sps:$4 sm:$0xff]  }
  0xa3   :  { %1776 = vmatpush2.bf16.msra.mxu0 %v3949_v8  ;;  %v4045_v8 = vld [vmem:[#allocation2 + $0x14c] ss:$16 sps:$4 sm:$0xff]  }
  0xa4   :  { %1817 = vmatpush2.bf16.msra.mxu1 %v3952_v9  ;;  %1777 = vmatprep.subr.bf16.mxu0 %v3957_v10  ;;  %v4048_v9 = vld [vmem:[#allocation2 + $0x34c] ss:$16 sps:$4 sm:$0xff]   ;;  %v4043_v10 = vld [vmem:[#allocation2 + $0x148] ss:$16 sps:$4 sm:$0xff]  }
  0xa5   :  { %1818 = vmatprep.subr.bf16.mxu1 %v3960_v11  ;;  %v4046_v11 = vld [vmem:[#allocation2 + $0x348] ss:$16 sps:$4 sm:$0xff]  }
  0xa7   :  { %1778 = vmatpush2.bf16.msra.mxu0 %v3955_v12  ;;  %v4051_v12 = vld [vmem:[#allocation2 + $0x12c] ss:$16 sps:$4 sm:$0xff]  }
  0xa8   :  { %1819 = vmatpush2.bf16.msra.mxu1 %v3958_v13  ;;  %1829 = vmatprep.subr.bf16.mxu0 %v3967_v14  ;;  %v4054_v13 = vld [vmem:[#allocation2 + $0x32c] ss:$16 sps:$4 sm:$0xff]   ;;  %v4049_v14 = vld [vmem:[#allocation2 + $0x128] ss:$16 sps:$4 sm:$0xff]  }
  0xa9   :  { %1870 = vmatprep.subr.bf16.mxu1 %v3970_v15  ;;  %v4052_v15 = vld [vmem:[#allocation2 + $0x328] ss:$16 sps:$4 sm:$0xff]  }
  0xaa   :  { %1780 = vmatmul.mubr.bf16.vlgmr.msra.gmra.mxu0 %v4514_v16 }
  0xab   :  { %1821 = vmatmul.mubr.bf16.vlgmr.msra.gmra.mxu1 %v4518_v17  ;;  %1830 = vmatpush1.bf16.msra.mxu0 %v3965_v18  ;;  %v4057_v18 = vld [vmem:[#allocation2 + $0x10c] ss:$16 sps:$4 sm:$0xff]  }
  0xac   :  { %1871 = vmatpush1.bf16.msra.mxu1 %v3968_v19  ;;  %1831 = vmatprep.subr.bf16.mxu0 %v3973_v20  ;;  %v4060_v19 = vld [vmem:[#allocation2 + $0x30c] ss:$16 sps:$4 sm:$0xff]   ;;  %v4055_v20 = vld [vmem:[#allocation2 + $0x108] ss:$16 sps:$4 sm:$0xff]  }
  0xad   :  { %1872 = vmatprep.subr.bf16.mxu1 %v3976_v21  ;;  %1861 = vmatprep.mubr.bf16.mxu0 %v4477_v47  ;;  %v3992_v47 = vld [vmem:[#allocation2 + $0x268] ss:$16 sps:$4 sm:$0xff]  }
  0xae   :  { %1902 = vmatprep.mubr.bf16.mxu1 %v4482_v51  ;;  %v3997_v51 = vld [vmem:[#allocation2 + $0x4c] ss:$16 sps:$4 sm:$0xff]   ;;  %v4058_v21 = vld [vmem:[#allocation2 + $0x308] ss:$16 sps:$4 sm:$0xff]  }
  0xaf   :  { %1832 = vmatpush1.bf16.msra.mxu0 %v3971_v22  ;;  %v4063_v22 = vld [vmem:[#allocation2 + $0x4ec] ss:$16 sps:$4 sm:$0xff]  }
  0xb0   :  { %1873 = vmatpush1.bf16.msra.mxu1 %v3974_v23  ;;  %1833 = vmatprep.subr.bf16.mxu0 %v3979_v24  ;;  %v4066_v23 = vld [vmem:[#allocation2 + $0x6ec] ss:$16 sps:$4 sm:$0xff]   ;;  %v4061_v24 = vld [vmem:[#allocation2 + $0x4e8] ss:$16 sps:$4 sm:$0xff]  }
  0xb1   :  { %1874 = vmatprep.subr.bf16.mxu1 %v3982_v25  ;;  %v4064_v25 = vld [vmem:[#allocation2 + $0x6e8] ss:$16 sps:$4 sm:$0xff]  }
  0xb3   :  { %1834 = vmatpush1.bf16.msra.mxu0 %v3977_v26  ;;  %v4069_v26 = vld [vmem:[#allocation2 + $0x4cc] ss:$16 sps:$4 sm:$0xff]  }
  0xb4   :  { %1875 = vmatpush1.bf16.msra.mxu1 %v3980_v27  ;;  %1835 = vmatprep.subr.bf16.mxu0 %v3985_v28  ;;  %v4072_v27 = vld [vmem:[#allocation2 + $0x6cc] ss:$16 sps:$4 sm:$0xff]   ;;  %v4067_v28 = vld [vmem:[#allocation2 + $0x4c8] ss:$16 sps:$4 sm:$0xff]  }
  0xb5   :  { %1876 = vmatprep.subr.bf16.mxu1 %v3988_v29  ;;  %v4070_v29 = vld [vmem:[#allocation2 + $0x6c8] ss:$16 sps:$4 sm:$0xff]  }
  0xb7   :  { %1836 = vmatpush1.bf16.msra.mxu0 %v3983_v30  ;;  %v4075_v30 = vld [vmem:[#allocation2 + $0x4ac] ss:$16 sps:$4 sm:$0xff]  }
  0xb8   :  { %1877 = vmatpush1.bf16.msra.mxu1 %v3986_v31  ;;  %1837 = vmatprep.subr.bf16.mxu0 %v3991_v32  ;;  %v4078_v31 = vld [vmem:[#allocation2 + $0x6ac] ss:$16 sps:$4 sm:$0xff]   ;;  %v4073_v32 = vld [vmem:[#allocation2 + $0x4a8] ss:$16 sps:$4 sm:$0xff]  }
  0xb9   :  { %1878 = vmatprep.subr.bf16.mxu1 %v3994_v33  ;;  %v4076_v33 = vld [vmem:[#allocation2 + $0x6a8] ss:$16 sps:$4 sm:$0xff]  }
  0xbb   :  { %1838 = vmatpush1.bf16.msra.mxu0 %v3989_v34  ;;  %v4081_v34 = vld [vmem:[#allocation2 + $0x48c] ss:$16 sps:$4 sm:$0xff]  }
  0xbc   :  { %1879 = vmatpush1.bf16.msra.mxu1 %v3992_v47  ;;  %1839 = vmatprep.subr.bf16.mxu0 %v3997_v51  ;;  %v4079_v47 = vld [vmem:[#allocation2 + $0x488] ss:$16 sps:$4 sm:$0xff]   ;;  %v4087_v51 = vld [vmem:[#allocation2 + $0x46c] ss:$16 sps:$4 sm:$0xff]  }
  0xbd   :  { %1880 = vmatprep.subr.bf16.mxu1 %v4000_v35  ;;  %v4090_v35 = vld [vmem:[#allocation2 + $0x66c] ss:$16 sps:$4 sm:$0xff]  }
  0xbf   :  { %1840 = vmatpush1.bf16.msra.mxu0 %v3995_v38  ;;  %v4085_v38 = vld [vmem:[#allocation2 + $0x468] ss:$16 sps:$4 sm:$0xff]  }
  0xc0   :  { %1881 = vmatpush1.bf16.msra.mxu1 %v3998_v39  ;;  %1841 = vmatprep.subr.bf16.mxu0 %v4003_v40  ;;  %v4088_v39 = vld [vmem:[#allocation2 + $0x668] ss:$16 sps:$4 sm:$0xff]  }
  0xc1   :  { %1882 = vmatprep.subr.bf16.mxu1 %v4006_v41  ;;  %v4091_v40 = vld [vmem:[#allocation2 + $0x448] ss:$16 sps:$4 sm:$0xff]  }
  0xc2   :  { %v4094_v41 = vld [vmem:[#allocation2 + $0x648] ss:$16 sps:$4 sm:$0xff]  }
  0xc3   :  { %1842 = vmatpush1.bf16.msra.mxu0 %v4001_v42  ;;  %v4099_v42 = vld [vmem:[#allocation2 + $0x42c] ss:$16 sps:$4 sm:$0xff]  }
  0xc4   :  { %1883 = vmatpush1.bf16.msra.mxu1 %v4004_v43  ;;  %1843 = vmatprep.subr.bf16.mxu0 %v4009_v44  ;;  %v4102_v43 = vld [vmem:[#allocation2 + $0x62c] ss:$16 sps:$4 sm:$0xff]   ;;  %v4097_v44 = vld [vmem:[#allocation2 + $0x428] ss:$16 sps:$4 sm:$0xff]  }
  0xc5   :  { %1884 = vmatprep.subr.bf16.mxu1 %v4012_v45  ;;  %v4100_v45 = vld [vmem:[#allocation2 + $0x628] ss:$16 sps:$4 sm:$0xff]  }
  0xc7   :  { %1844 = vmatpush1.bf16.msra.mxu0 %v4007_v46  ;;  %v4105_v46 = vld [vmem:[#allocation2 + $0x40c] ss:$16 sps:$4 sm:$0xff]  }
  0xc8   :  { %1885 = vmatpush1.bf16.msra.mxu1 %v4010_v48  ;;  %1845 = vmatprep.subr.bf16.mxu0 %v4015_v49  ;;  %v4108_v48 = vld [vmem:[#allocation2 + $0x60c] ss:$16 sps:$4 sm:$0xff]   ;;  %v4103_v49 = vld [vmem:[#allocation2 + $0x408] ss:$16 sps:$4 sm:$0xff]  }
  0xc9   :  { %1886 = vmatprep.subr.bf16.mxu1 %v4018_v50  ;;  %v4106_v50 = vld [vmem:[#allocation2 + $0x608] ss:$16 sps:$4 sm:$0xff]  }
  0xcb   :  { %1846 = vmatpush2.bf16.msra.mxu0 %v4013_v52  ;;  %v4111_v52 = vld [vmem:[#allocation2 + $0x5ec] ss:$16 sps:$4 sm:$0xff]  }
  0xcc   :  { %1887 = vmatpush2.bf16.msra.mxu1 %v4016_v53  ;;  %1847 = vmatprep.subr.bf16.mxu0 %v4021_v54  ;;  %v4114_v53 = vld [vmem:[#allocation2 + $0x7ec] ss:$16 sps:$4 sm:$0xff]   ;;  %v4109_v54 = vld [vmem:[#allocation2 + $0x5e8] ss:$16 sps:$4 sm:$0xff]  }
  0xcd   :  { %1888 = vmatprep.subr.bf16.mxu1 %v4024_v55  ;;  %v4112_v55 = vld [vmem:[#allocation2 + $0x7e8] ss:$16 sps:$4 sm:$0xff]  }
  0xcf   :  { %1848 = vmatpush2.bf16.msra.mxu0 %v4019_v56  ;;  %v4117_v56 = vld [vmem:[#allocation2 + $0x5cc] ss:$16 sps:$4 sm:$0xff]  }
  0xd0   :  { %1889 = vmatpush2.bf16.msra.mxu1 %v4022_v57  ;;  %1849 = vmatprep.subr.bf16.mxu0 %v4027_v58  ;;  %v4120_v57 = vld [vmem:[#allocation2 + $0x7cc] ss:$16 sps:$4 sm:$0xff]   ;;  %v4115_v58 = vld [vmem:[#allocation2 + $0x5c8] ss:$16 sps:$4 sm:$0xff]  }
  0xd1   :  { %1890 = vmatprep.subr.bf16.mxu1 %v4030_v59  ;;  %v4118_v59 = vld [vmem:[#allocation2 + $0x7c8] ss:$16 sps:$4 sm:$0xff]  }
  0xd3   :  { %1850 = vmatpush2.bf16.msra.mxu0 %v4025_v60  ;;  %v4123_v60 = vld [vmem:[#allocation2 + $0x5ac] ss:$16 sps:$4 sm:$0xff]  }
  0xd4   :  { %1891 = vmatpush2.bf16.msra.mxu1 %v4028_v61  ;;  %1851 = vmatprep.subr.bf16.mxu0 %v4033_v62  ;;  %v4126_v61 = vld [vmem:[#allocation2 + $0x7ac] ss:$16 sps:$4 sm:$0xff]   ;;  %v4121_v62 = vld [vmem:[#allocation2 + $0x5a8] ss:$16 sps:$4 sm:$0xff]  }
  0xd5   :  { %1892 = vmatprep.subr.bf16.mxu1 %v4036_v63  ;;  %v4124_v63 = vld [vmem:[#allocation2 + $0x7a8] ss:$16 sps:$4 sm:$0xff]  }
  0xd7   :  { %1852 = vmatpush2.bf16.msra.mxu0 %v4031_v0  ;;  %v4129_v0 = vld [vmem:[#allocation2 + $0x58c] ss:$16 sps:$4 sm:$0xff]  }
  0xd8   :  { %1893 = vmatpush2.bf16.msra.mxu1 %v4034_v1  ;;  %1853 = vmatprep.subr.bf16.mxu0 %v4039_v2  ;;  %v4132_v1 = vld [vmem:[#allocation2 + $0x78c] ss:$16 sps:$4 sm:$0xff]   ;;  %v4127_v2 = vld [vmem:[#allocation2 + $0x588] ss:$16 sps:$4 sm:$0xff]  }
  0xd9   :  { %1894 = vmatprep.subr.bf16.mxu1 %v4042_v3  ;;  %v4130_v3 = vld [vmem:[#allocation2 + $0x788] ss:$16 sps:$4 sm:$0xff]  }
  0xdb   :  { %1854 = vmatpush2.bf16.msra.mxu0 %v4037_v4  ;;  %v4135_v4 = vld [vmem:[#allocation2 + $0x56c] ss:$16 sps:$4 sm:$0xff]  }
  0xdc   :  { %1895 = vmatpush2.bf16.msra.mxu1 %v4040_v5  ;;  %1855 = vmatprep.subr.bf16.mxu0 %v4045_v8  ;;  %v4138_v5 = vld [vmem:[#allocation2 + $0x76c] ss:$16 sps:$4 sm:$0xff]   ;;  %v4133_v8 = vld [vmem:[#allocation2 + $0x568] ss:$16 sps:$4 sm:$0xff]  }
  0xdd   :  { %1896 = vmatprep.subr.bf16.mxu1 %v4048_v9  ;;  %v4136_v9 = vld [vmem:[#allocation2 + $0x768] ss:$16 sps:$4 sm:$0xff]  }
  0xdf   :  { %1856 = vmatpush2.bf16.msra.mxu0 %v4043_v10  ;;  %v4141_v10 = vld [vmem:[#allocation2 + $0x54c] ss:$16 sps:$4 sm:$0xff]  }
  0xe0   :  { %1897 = vmatpush2.bf16.msra.mxu1 %v4046_v11  ;;  %1857 = vmatprep.subr.bf16.mxu0 %v4051_v12  ;;  %v4144_v11 = vld [vmem:[#allocation2 + $0x74c] ss:$16 sps:$4 sm:$0xff]   ;;  %v4139_v12 = vld [vmem:[#allocation2 + $0x548] ss:$16 sps:$4 sm:$0xff]  }
  0xe1   :  { %1898 = vmatprep.subr.bf16.mxu1 %v4054_v13  ;;  %v4142_v13 = vld [vmem:[#allocation2 + $0x748] ss:$16 sps:$4 sm:$0xff]  }
  0xe3   :  { %1858 = vmatpush2.bf16.msra.mxu0 %v4049_v14  ;;  %v4147_v14 = vld [vmem:[#allocation2 + $0x52c] ss:$16 sps:$4 sm:$0xff]  }
  0xe4   :  { %1899 = vmatpush2.bf16.msra.mxu1 %v4052_v15  ;;  %1859 = vmatprep.subr.bf16.mxu0 %v4057_v18  ;;  %v4150_v15 = vld [vmem:[#allocation2 + $0x72c] ss:$16 sps:$4 sm:$0xff]   ;;  %v4145_v18 = vld [vmem:[#allocation2 + $0x528] ss:$16 sps:$4 sm:$0xff]  }
  0xe5   :  { %1900 = vmatprep.subr.bf16.mxu1 %v4060_v19  ;;  %v4148_v19 = vld [vmem:[#allocation2 + $0x728] ss:$16 sps:$4 sm:$0xff]  }
  0xe7   :  { %1860 = vmatpush2.bf16.msra.mxu0 %v4055_v20  ;;  %v4153_v20 = vld [vmem:[#allocation2 + $0x50c] ss:$16 sps:$4 sm:$0xff]  }
  0xe8   :  { %1901 = vmatpush2.bf16.msra.mxu1 %v4058_v21  ;;  %1911 = vmatprep.subr.bf16.mxu0 %v4063_v22  ;;  %v4156_v21 = vld [vmem:[#allocation2 + $0x70c] ss:$16 sps:$4 sm:$0xff]   ;;  %v4151_v22 = vld [vmem:[#allocation2 + $0x508] ss:$16 sps:$4 sm:$0xff]  }
  0xe9   :  { %1952 = vmatprep.subr.bf16.mxu1 %v4066_v23  ;;  %v4154_v23 = vld [vmem:[#allocation2 + $0x708] ss:$16 sps:$4 sm:$0xff]  }
  0xea   :  { %1862 = vmatmul.mubr.bf16.vlgmr.msra.gmra.mxu0 %v4486_v6  ;;  %v4084_v6 = vld [vmem:[#allocation2 + $0x68c] ss:$16 sps:$4 sm:$0xff]  }
  0xeb   :  { %1903 = vmatmul.mubr.bf16.vlgmr.msra.gmra.mxu1 %v4488_v7  ;;  %1912 = vmatpush1.bf16.msra.mxu0 %v4061_v24  ;;  %v4082_v7 = vld [vmem:[#allocation2 + $0x688] ss:$16 sps:$4 sm:$0xff]  }
  0xec   :  { %1953 = vmatpush1.bf16.msra.mxu1 %v4064_v25  ;;  %1913 = vmatprep.subr.bf16.mxu0 %v4069_v26  ;;  %v4159_v24 = vld [vmem:[#allocation5 + $0xac] ss:$12 sps:$4 sm:$0xff]   ;;  %v4157_v25 = vld [vmem:[#allocation5 + $0xa8] ss:$12 sps:$4 sm:$0xff]  }
  0xed   :  { %1954 = vmatprep.subr.bf16.mxu1 %v4072_v27  ;;  %1943 = vmatprep.mubr.bf16.mxu0 %v4504_v36  ;;  %v4093_v36 = vld [vmem:[#allocation2 + $0x44c] ss:$16 sps:$4 sm:$0xff]   ;;  %v4162_v26 = vld [vmem:[#allocation5 + $0x94] ss:$12 sps:$4 sm:$0xff]  }
  0xee   :  { %1984 = vmatprep.mubr.bf16.mxu1 %v4508_v37  ;;  %v4096_v37 = vld [vmem:[#allocation2 + $0x64c] ss:$16 sps:$4 sm:$0xff]  }
  0xef   :  { %1914 = vmatpush1.bf16.msra.mxu0 %v4067_v28 }
  0xf0   :  { %1955 = vmatpush1.bf16.msra.mxu1 %v4070_v29  ;;  %1915 = vmatprep.subr.bf16.mxu0 %v4075_v30  ;;  %v4160_v29 = vld [vmem:[#allocation5 + $0x90] ss:$12 sps:$4 sm:$0xff]  }
  0xf1   :  { %1956 = vmatprep.subr.bf16.mxu1 %v4078_v31 }
  0xf3   :  { %1916 = vmatpush1.bf16.msra.mxu0 %v4073_v32  ;;  %v4165_v32 = vld [vmem:[#allocation5 + $0x7c] ss:$12 sps:$4 sm:$0xff]  }
  0xf4   :  { %1957 = vmatpush1.bf16.msra.mxu1 %v4076_v33  ;;  %1917 = vmatprep.subr.bf16.mxu0 %v4081_v34 }
  0xf5   :  { %1958 = vmatprep.subr.bf16.mxu1 %v4084_v6  ;;  %v4163_v6 = vld [vmem:[#allocation5 + $0x78] ss:$12 sps:$4 sm:$0xff]  }
  0xf7   :  { %1918 = vmatpush1.bf16.msra.mxu0 %v4079_v47 }
  0xf8   :  { %1959 = vmatpush1.bf16.msra.mxu1 %v4082_v7  ;;  %1919 = vmatprep.subr.bf16.mxu0 %v4087_v51  ;;  %v4168_v51 = vld [vmem:[#allocation5 + $0x64] ss:$12 sps:$4 sm:$0xff]  }
  0xf9   :  { %1960 = vmatprep.subr.bf16.mxu1 %v4090_v35  ;;  %v4221_v35 = vld [vmem:[#allocation5 + $0x228] ss:$12 sps:$4 sm:$0xff]  }
  0xfb   :  { %1920 = vmatpush1.bf16.msra.mxu0 %v4085_v38  ;;  %v4226_v38 = vld [vmem:[#allocation5 + $0x214] ss:$12 sps:$4 sm:$0xff]  }
  0xfc   :  { %1961 = vmatpush1.bf16.msra.mxu1 %v4088_v39  ;;  %1921 = vmatprep.subr.bf16.mxu0 %v4093_v36  ;;  %v4224_v39 = vld [vmem:[#allocation5 + $0x210] ss:$12 sps:$4 sm:$0xff]   ;;  %v4171_v36 = vld [vmem:[#allocation5 + $0x4c] ss:$12 sps:$4 sm:$0xff]  }
  0xfd   :  { %1962 = vmatprep.subr.bf16.mxu1 %v4096_v37  ;;  %v4229_v37 = vld [vmem:[#allocation5 + $0x1fc] ss:$12 sps:$4 sm:$0xff]  }
  0xff   :  { %1922 = vmatpush1.bf16.msra.mxu0 %v4091_v40  ;;  %v4169_v40 = vld [vmem:[#allocation5 + $0x48] ss:$12 sps:$4 sm:$0xff]  }
 0x100   :  { %1963 = vmatpush1.bf16.msra.mxu1 %v4094_v41  ;;  %1923 = vmatprep.subr.bf16.mxu0 %v4099_v42  ;;  %v4227_v41 = vld [vmem:[#allocation5 + $0x1f8] ss:$12 sps:$4 sm:$0xff]   ;;  %v4174_v42 = vld [vmem:[#allocation5 + $0x34] ss:$12 sps:$4 sm:$0xff]  }
 0x101   :  { %1964 = vmatprep.subr.bf16.mxu1 %v4102_v43  ;;  %v4232_v43 = vld [vmem:[#allocation5 + $0x1e4] ss:$12 sps:$4 sm:$0xff]  }
 0x103   :  { %1924 = vmatpush1.bf16.msra.mxu0 %v4097_v44  ;;  %v4172_v44 = vld [vmem:[#allocation5 + $0x30] ss:$12 sps:$4 sm:$0xff]  }
 0x104   :  { %1965 = vmatpush1.bf16.msra.mxu1 %v4100_v45  ;;  %1925 = vmatprep.subr.bf16.mxu0 %v4105_v46  ;;  %v4230_v45 = vld [vmem:[#allocation5 + $0x1e0] ss:$12 sps:$4 sm:$0xff]   ;;  %v4177_v46 = vld [vmem:[#allocation5 + $0x1c] ss:$12 sps:$4 sm:$0xff]  }
 0x105   :  { %1966 = vmatprep.subr.bf16.mxu1 %v4108_v48  ;;  %v4235_v48 = vld [vmem:[#allocation5 + $0x1cc] ss:$12 sps:$4 sm:$0xff]  }
 0x107   :  { %1926 = vmatpush1.bf16.msra.mxu0 %v4103_v49  ;;  %v4175_v49 = vld [vmem:[#allocation5 + $0x18] ss:$12 sps:$4 sm:$0xff]  }
 0x108   :  { %1967 = vmatpush1.bf16.msra.mxu1 %v4106_v50  ;;  %1927 = vmatprep.subr.bf16.mxu0 %v4111_v52  ;;  %v4233_v50 = vld [vmem:[#allocation5 + $0x1c8] ss:$12 sps:$4 sm:$0xff]   ;;  %v4180_v52 = vld [vmem:[#allocation5 + $0x4] ss:$12 sps:$4 sm:$0xff]  }
 0x109   :  { %1968 = vmatprep.subr.bf16.mxu1 %v4114_v53  ;;  %v4238_v53 = vld [vmem:[#allocation5 + $0x1b4] ss:$12 sps:$4 sm:$0xff]  }
 0x10b   :  { %1928 = vmatpush2.bf16.msra.mxu0 %v4109_v54  ;;  %v4178_v54 = vld [vmem:[#allocation5] ss:$12 sps:$4 sm:$0xff]  }
 0x10c   :  { %1969 = vmatpush2.bf16.msra.mxu1 %v4112_v55  ;;  %1929 = vmatprep.subr.bf16.mxu0 %v4117_v56  ;;  %v4236_v55 = vld [vmem:[#allocation5 + $0x1b0] ss:$12 sps:$4 sm:$0xff]   ;;  %v4183_v56 = vld [vmem:[#allocation5 + $0x16c] ss:$12 sps:$4 sm:$0xff]  }
 0x10d   :  { %1970 = vmatprep.subr.bf16.mxu1 %v4120_v57  ;;  %v4241_v57 = vld [vmem:[#allocation5 + $0x19c] ss:$12 sps:$4 sm:$0xff]  }
 0x10f   :  { %1930 = vmatpush2.bf16.msra.mxu0 %v4115_v58  ;;  %v4181_v58 = vld [vmem:[#allocation5 + $0x168] ss:$12 sps:$4 sm:$0xff]  }
 0x110   :  { %1971 = vmatpush2.bf16.msra.mxu1 %v4118_v59  ;;  %1931 = vmatprep.subr.bf16.mxu0 %v4123_v60  ;;  %v4239_v59 = vld [vmem:[#allocation5 + $0x198] ss:$12 sps:$4 sm:$0xff]   ;;  %v4186_v60 = vld [vmem:[#allocation5 + $0x154] ss:$12 sps:$4 sm:$0xff]  }
 0x111   :  { %1972 = vmatprep.subr.bf16.mxu1 %v4126_v61  ;;  %v4244_v61 = vld [vmem:[#allocation5 + $0x184] ss:$12 sps:$4 sm:$0xff]  }
 0x113   :  { %1932 = vmatpush2.bf16.msra.mxu0 %v4121_v62  ;;  %v4184_v62 = vld [vmem:[#allocation5 + $0x150] ss:$12 sps:$4 sm:$0xff]  }
 0x114   :  { %1973 = vmatpush2.bf16.msra.mxu1 %v4124_v63  ;;  %1933 = vmatprep.subr.bf16.mxu0 %v4129_v0  ;;  %v4242_v63 = vld [vmem:[#allocation5 + $0x180] ss:$12 sps:$4 sm:$0xff]   ;;  %v4189_v0 = vld [vmem:[#allocation5 + $0x13c] ss:$12 sps:$4 sm:$0xff]  }
 0x115   :  { %1974 = vmatprep.subr.bf16.mxu1 %v4132_v1  ;;  %v4247_v1 = vld [vmem:[#allocation5 + $0x2ec] ss:$12 sps:$4 sm:$0xff]  }
 0x117   :  { %1934 = vmatpush2.bf16.msra.mxu0 %v4127_v2  ;;  %v4187_v2 = vld [vmem:[#allocation5 + $0x138] ss:$12 sps:$4 sm:$0xff]  }
 0x118   :  { %1975 = vmatpush2.bf16.msra.mxu1 %v4130_v3  ;;  %1935 = vmatprep.subr.bf16.mxu0 %v4135_v4  ;;  %v4245_v3 = vld [vmem:[#allocation5 + $0x2e8] ss:$12 sps:$4 sm:$0xff]   ;;  %v4192_v4 = vld [vmem:[#allocation5 + $0x124] ss:$12 sps:$4 sm:$0xff]  }
 0x119   :  { %1976 = vmatprep.subr.bf16.mxu1 %v4138_v5  ;;  %v4250_v5 = vld [vmem:[#allocation5 + $0x2d4] ss:$12 sps:$4 sm:$0xff]  }
 0x11b   :  { %1936 = vmatpush2.bf16.msra.mxu0 %v4133_v8  ;;  %v4190_v8 = vld [vmem:[#allocation5 + $0x120] ss:$12 sps:$4 sm:$0xff]  }
 0x11c   :  { %1977 = vmatpush2.bf16.msra.mxu1 %v4136_v9  ;;  %1937 = vmatprep.subr.bf16.mxu0 %v4141_v10  ;;  %v4248_v9 = vld [vmem:[#allocation5 + $0x2d0] ss:$12 sps:$4 sm:$0xff]   ;;  %v4195_v10 = vld [vmem:[#allocation5 + $0x10c] ss:$12 sps:$4 sm:$0xff]  }
 0x11d   :  { %1978 = vmatprep.subr.bf16.mxu1 %v4144_v11  ;;  %v4253_v11 = vld [vmem:[#allocation5 + $0x2bc] ss:$12 sps:$4 sm:$0xff]  }
 0x11f   :  { %1938 = vmatpush2.bf16.msra.mxu0 %v4139_v12  ;;  %v337_v12 = vlaneseq }
 0x120   :  { %1979 = vmatpush2.bf16.msra.mxu1 %v4142_v13  ;;  %1939 = vmatprep.subr.bf16.mxu0 %v4147_v14  ;;  %v4193_v13 = vld [vmem:[#allocation5 + $0x108] ss:$12 sps:$4 sm:$0xff]   ;;  %v4251_v14 = vld [vmem:[#allocation5 + $0x2b8] ss:$12 sps:$4 sm:$0xff]  }
 0x121   :  { %1980 = vmatprep.subr.bf16.mxu1 %v4150_v15  ;;  %v4198_v15 = vld [vmem:[#allocation5 + $0xf4] ss:$12 sps:$4 sm:$0xff]  }
 0x123   :  { %1940 = vmatpush2.bf16.msra.mxu0 %v4145_v18  ;;  %v4256_v18 = vld [vmem:[#allocation5 + $0x2a4] ss:$12 sps:$4 sm:$0xff]  }
 0x124   :  { %1981 = vmatpush2.bf16.msra.mxu1 %v4148_v19  ;;  %1941 = vmatprep.subr.bf16.mxu0 %v4153_v20  ;;  %v4538_v19 = vshrl.u32 %v337_v12, 7  ;;  %v4196_v20 = vld [vmem:[#allocation5 + $0xf0] ss:$12 sps:$4 sm:$0xff]  }
 0x125   :  { %1982 = vmatprep.subr.bf16.mxu1 %v4156_v21  ;;  %v4254_v21 = vld [vmem:[#allocation5 + $0x2a0] ss:$12 sps:$4 sm:$0xff]  }
 0x127   :  { %1942 = vmatpush2.bf16.msra.mxu0 %v4151_v22  ;;  %v4201_v22 = vld [vmem:[#allocation5 + $0xdc] ss:$12 sps:$4 sm:$0xff]  }
 0x128   :  { %1983 = vmatpush2.bf16.msra.mxu1 %v4154_v23  ;;  %2658 = vmatprep.subr.bf16.mxu0 %v4159_v24  ;;  %v4259_v23 = vld [vmem:[#allocation5 + $0x28c] ss:$12 sps:$4 sm:$0xff]   ;;  %v339_v24 = vsub.s32 0, %v4538_v19 }
 0x12a   :  { %v4528_v27 = vpop.f32.mrf.mxu0  ;;  %1944 = vmatmul.mubr.bf16.vlgmr.msra.gmra.mxu0 %v4514_v16  ;;  %v4223_v16 = vld [vmem:[#allocation5 + $0x22c] ss:$12 sps:$4 sm:$0xff]  }
 0x12b   :  { %v4530_v28 = vpop.f32.mrf.mxu1  ;;  %1985 = vmatmul.mubr.bf16.vlgmr.msra.gmra.mxu1 %v4518_v17  ;;  %2659 = vmatpush1.bf16.msra.mxu0 %v4157_v25  ;;  %v4166_v17 = vld [vmem:[#allocation5 + $0x60] ss:$12 sps:$4 sm:$0xff]  }
 0x12c   :  { %v4534_v30 = vpop.f32.mrf.mxu0  ;;  %2660 = vmatprep.subr.bf16.mxu0 %v4162_v26  ;;  %2699 = vmatprep.subr.bf16.mxu1 %v4223_v16  ;;  %v4544_v25 = vld [vmem:[%s4627_s2] sm:$0xf]  ;;  %v343_v26 = vsub.s32 1, %v4538_v19 }
 0x12d   :  { %v4536_v31 = vpop.f32.mrf.mxu1  ;;  %2700 = vmatpush1.bf16.msra.mxu1 %v4221_v35  ;;  %v4205_v35 = vld [vmem:[#allocation5 + $0x170] ss:$12 sps:$4 sm:$0xff]  }
 0x12e   :  { %v1703_v33 = vpop.f32.mrf.mxu0  ;;  %2701 = vmatprep.subr.bf16.mxu1 %v4226_v38 }
 0x12f   :  { %v1744_v34 = vpop.f32.mrf.mxu1  ;;  %2661 = vmatpush1.bf16.msra.mxu0 %v4160_v29  ;;  %v4199_v29 = vld [vmem:[#allocation5 + $0xd8] ss:$12 sps:$4 sm:$0xff]  }
 0x130   :  { %v1704_v47 = vpop.f32.mrf.mxu0  ;;  %2662 = vmatprep.subr.bf16.mxu0 %v4165_v32  ;;  %v4257_v32 = vld [vmem:[#allocation5 + $0x288] ss:$12 sps:$4 sm:$0xff]   ;;  %v4204_v33 = vld [vmem:[#allocation5 + $0xc4] ss:$12 sps:$4 sm:$0xff]  }
 0x131   :  { %v1745_v7 = vpop.f32.mrf.mxu1  ;;  %2702 = vmatpush1.bf16.msra.mxu1 %v4224_v39  ;;  %v4262_v34 = vld [vmem:[#allocation5 + $0x274] ss:$12 sps:$4 sm:$0xff]   ;;  %v344_v47 = vrot.slane %v4544_v25, %v343_v26 }
 0x132   :  { %2703 = vmatprep.subr.bf16.mxu1 %v4229_v37  ;;  %v4202_v7 = vld [vmem:[#allocation5 + $0xc0] ss:$12 sps:$4 sm:$0xff]  }
 0x133   :  { %2663 = vmatpush1.bf16.msra.mxu0 %v4163_v6  ;;  %v340_v6 = vrot.slane %v4544_v25, %v339_v24  ;;  %v1702_v38 = vadd.f32 %v4534_v30, %v344_v47 }
 0x134   :  { %2664 = vmatprep.subr.bf16.mxu0 %v4168_v51  ;;  %v4260_v51 = vld [vmem:[#allocation5 + $0x270] ss:$12 sps:$4 sm:$0xff]  }
 0x135   :  { %2704 = vmatpush1.bf16.msra.mxu1 %v4227_v41  ;;  %v1700_v16 = vadd.f32 %v4528_v27, %v340_v6  ;;  %v1743_v37 = vadd.f32 %v4536_v31, %v1702_v38  ;;  %v4292_v38 = vld [vmem:[#allocation7 + $0x20] sm:$0xff]  }
 0x136   :  { %2705 = vmatprep.subr.bf16.mxu1 %v4232_v43  ;;  %v4265_v43 = vld [vmem:[#allocation5 + $0x25c] ss:$12 sps:$4 sm:$0xff]  }
 0x137   :  { %2665 = vmatpush1.bf16.msra.mxu0 %v4166_v17  ;;  %v1741_v17 = vadd.f32 %v4530_v28, %v1700_v16  ;;  %v4268_v28 = vld [vmem:[#allocation5 + $0x244] ss:$12 sps:$4 sm:$0xff]  }
 0x138   :  { %2666 = vmatprep.subr.bf16.mxu0 %v4171_v36 }
 0x139   :  { %2706 = vmatpush1.bf16.msra.mxu1 %v4230_v45 }
 0x13a   :  { %2707 = vmatprep.subr.bf16.mxu1 %v4235_v48 }
 0x13b   :  { %2667 = vmatpush1.bf16.msra.mxu0 %v4169_v40 }
 0x13c   :  { %2668 = vmatprep.subr.bf16.mxu0 %v4174_v42 }
 0x13d   :  { %2708 = vmatpush1.bf16.msra.mxu1 %v4233_v50 }
 0x13e   :  { %2709 = vmatprep.subr.bf16.mxu1 %v4238_v53 }
 0x13f   :  { %2669 = vmatpush1.bf16.msra.mxu0 %v4172_v44 }
 0x140   :  { %2670 = vmatprep.subr.bf16.mxu0 %v4177_v46  ;;  %v4263_v46 = vld [vmem:[#allocation5 + $0x258] ss:$12 sps:$4 sm:$0xff]  }
 0x141   :  { %2710 = vmatpush1.bf16.msra.mxu1 %v4236_v55  ;;  %v4206_v55 = vld [vmem:[#allocation5 + $0xb0] ss:$12 sps:$4 sm:$0xff]  }
 0x142   :  { %2711 = vmatprep.subr.bf16.mxu1 %v4241_v57  ;;  %v4207_v57 = vld [vmem:[#allocation5 + $0x158] ss:$12 sps:$4 sm:$0xff]  }
 0x143   :  { %2671 = vmatpush1.bf16.msra.mxu0 %v4175_v49 }
 0x144   :  { %2672 = vmatprep.subr.bf16.mxu0 %v4180_v52 }
 0x145   :  { %2712 = vmatpush1.bf16.msra.mxu1 %v4239_v59  ;;  %v4208_v59 = vld [vmem:[#allocation5 + $0x98] ss:$12 sps:$4 sm:$0xff]  }
 0x146   :  { %2713 = vmatprep.subr.bf16.mxu1 %v4244_v61  ;;  %v4210_v61 = vld [vmem:[#allocation5 + $0x80] ss:$12 sps:$4 sm:$0xff]  }
 0x147   :  { %2673 = vmatpush1.bf16.msra.mxu0 %v4178_v54  ;;  %v4266_v54 = vld [vmem:[#allocation5 + $0x240] ss:$12 sps:$4 sm:$0xff]  }
 0x148   :  { %2674 = vmatprep.subr.bf16.mxu0 %v4183_v56 }
 0x149   :  { %2714 = vmatpush1.bf16.msra.mxu1 %v4242_v63  ;;  %v4212_v63 = vld [vmem:[#allocation5 + $0x68] ss:$12 sps:$4 sm:$0xff]  }
 0x14a   :  { %2715 = vmatprep.subr.bf16.mxu1 %v4247_v1  ;;  %v4214_v1 = vld [vmem:[#allocation5 + $0x50] ss:$12 sps:$4 sm:$0xff]  }
 0x14b   :  { %2675 = vmatpush2.bf16.msra.mxu0 %v4181_v58  ;;  %v4269_v58 = vld [vmem:[#allocation5 + $0x2f0] ss:$12 sps:$4 sm:$0xff]  }
 0x14c   :  { %2676 = vmatprep.subr.bf16.mxu0 %v4186_v60  ;;  %v4209_v60 = vld [vmem:[#allocation5 + $0x140] ss:$12 sps:$4 sm:$0xff]  }
 0x14d   :  { %2716 = vmatpush2.bf16.msra.mxu1 %v4245_v3  ;;  %v4216_v3 = vld [vmem:[#allocation5 + $0x38] ss:$12 sps:$4 sm:$0xff]  }
 0x14e   :  { %2717 = vmatprep.subr.bf16.mxu1 %v4250_v5  ;;  %v4218_v5 = vld [vmem:[#allocation5 + $0x20] ss:$12 sps:$4 sm:$0xff]  }
 0x14f   :  { %2677 = vmatpush2.bf16.msra.mxu0 %v4184_v62  ;;  %v4211_v62 = vld [vmem:[#allocation5 + $0x128] ss:$12 sps:$4 sm:$0xff]  }
 0x150   :  { %2678 = vmatprep.subr.bf16.mxu0 %v4189_v0  ;;  %v4213_v0 = vld [vmem:[#allocation5 + $0x110] ss:$12 sps:$4 sm:$0xff]  }
 0x151   :  { %2718 = vmatpush2.bf16.msra.mxu1 %v4248_v9  ;;  %v4220_v9 = vld [vmem:[#allocation5 + $0x8] ss:$12 sps:$4 sm:$0xff]  }
 0x152   :  { %2719 = vmatprep.subr.bf16.mxu1 %v4253_v11 }
 0x153   :  { %2679 = vmatpush2.bf16.msra.mxu0 %v4187_v2  ;;  %v4215_v2 = vld [vmem:[#allocation5 + $0xf8] ss:$12 sps:$4 sm:$0xff]  }
 0x154   :  { %2680 = vmatprep.subr.bf16.mxu0 %v4192_v4  ;;  %v4217_v4 = vld [vmem:[#allocation5 + $0xe0] ss:$12 sps:$4 sm:$0xff]  }
 0x155   :  { %2720 = vmatpush2.bf16.msra.mxu1 %v4251_v14 }
 0x156   :  { %2721 = vmatprep.subr.bf16.mxu1 %v4256_v18 }
 0x157   :  { %2681 = vmatpush2.bf16.msra.mxu0 %v4190_v8  ;;  %v4219_v8 = vld [vmem:[#allocation5 + $0xc8] ss:$12 sps:$4 sm:$0xff]  }
 0x158   :  { %2682 = vmatprep.subr.bf16.mxu0 %v4195_v10 }
 0x159   :  { %2722 = vmatpush2.bf16.msra.mxu1 %v4254_v21  ;;  %v4285_v21 = vld [vmem:[#allocation7 + $0x78] sm:$0xff]  }
 0x15a   :  { %2723 = vmatprep.subr.bf16.mxu1 %v4259_v23  ;;  %v4287_v23 = vld [vmem:[#allocation7 + $0x70] sm:$0xff]  }
 0x15b   :  { %2683 = vmatpush2.bf16.msra.mxu0 %v4193_v13 }
 0x15c   :  { %2684 = vmatprep.subr.bf16.mxu0 %v4198_v15 }
 0x15d   :  { %2724 = vmatpush2.bf16.msra.mxu1 %v4257_v32  ;;  %v351_v32 = vsub.s32 3, %v4538_v19 }
 0x15e   :  { %2725 = vmatprep.subr.bf16.mxu1 %v4262_v34  ;;  %v4289_v34 = vld [vmem:[#allocation7 + $0x68] sm:$0xff]  }
 0x15f   :  { %2685 = vmatpush2.bf16.msra.mxu0 %v4196_v20  ;;  %v352_v47 = vrot.slane %v4544_v25, %v351_v32  ;;  %v4305_v32 = vld [vmem:[#allocation7 + $0x98] sm:$0xff]  }
 0x160   :  { %2686 = vmatprep.subr.bf16.mxu0 %v4201_v22  ;;  %v4286_v22 = vld [vmem:[#allocation7 + $0x38] sm:$0xff]  }
 0x161   :  { %2726 = vmatpush2.bf16.msra.mxu1 %v4260_v51  ;;  %v4291_v51 = vld [vmem:[#allocation7 + $0x60] sm:$0xff]  }
 0x162   :  { %2727 = vmatprep.subr.bf16.mxu1 %v4265_v43 }
 0x163   :  { %2687 = vmatpush2.bf16.msra.mxu0 %v4199_v29  ;;  %v347_v29 = vsub.s32 2, %v4538_v19  ;;  %v4310_v19 = vld [vmem:[%s4632_s7 + $0x30] sm:$0xff]  }
 0x164   :  { %2688 = vmatprep.subr.bf16.mxu0 %v4204_v33  ;;  %v4288_v33 = vld [vmem:[#allocation7 + $0x30] sm:$0xff]  }
 0x165   :  { %2728 = vmatpush2.bf16.msra.mxu1 %v4263_v46  ;;  %v348_v6 = vrot.slane %v4544_v25, %v347_v29  ;;  %v4295_v25 = vld [vmem:[#allocation7 + $0x50] sm:$0xff]  }
 0x166   :  { %2729 = vmatprep.subr.bf16.mxu1 %v4268_v28 }
 0x167   :  { %2689 = vmatpush2.bf16.msra.mxu0 %v4202_v7  ;;  %v4290_v7 = vld [vmem:[#allocation7 + $0x28] sm:$0xff]  }
 0x168   :  { %3629 = vmatprep.subr.bf16.mxu0 %v4205_v35 }
 0x169   :  { %2730 = vmatpush2.bf16.msra.mxu1 %v4266_v54 }
 0x16a   :  { %v1781_v39 = vpop.f32.mrf.mxu0  ;;  %3651 = vmatprep.subr.bf16.mxu1 %v4269_v58  ;;  %v4273_v58 = vld [vmem:[#allocation5 + $0x2c0] ss:$12 sps:$4 sm:$0xff]  }
 0x16b   :  { %v1822_v36 = vpop.f32.mrf.mxu1  ;;  %v1782_v40 = vadd.f32 %v1781_v39, %v1741_v17  ;;  %v4293_v17 = vld [vmem:[#allocation7 + $0x58] sm:$0xff]  }
 0x16c   :  { %v1783_v41 = vpop.f32.mrf.mxu0 }
 0x16d   :  { %v1824_v42 = vpop.f32.mrf.mxu1  ;;  %v1823_v44 = vadd.f32 %v1822_v36, %v1782_v40  ;;  %v1784_v45 = vadd.f32 %v1783_v41, %v1743_v37 }
 0x16e   :  { %v1785_v48 = vpop.f32.mrf.mxu0 }
 0x16f   :  { %v1826_v27 = vpop.f32.mrf.mxu1  ;;  %v1825_v30 = vadd.f32 %v1824_v42, %v1784_v45  ;;  %v1993_v49 = vmax.f32 %v1823_v44, 0.0  ;;  %v4294_v42 = vld [vmem:[#allocation7 + $0x18] sm:$0xff]  }
 0x170   :  { %v1786_v50 = vpop.f32.mrf.mxu0 }
 0x171   :  { %v1827_v52 = vpop.f32.mrf.mxu1  ;;  %v1994_v53 = vmax.f32 %v1825_v30, 0.0  ;;  %v1997_v56 = vpack.c.bf16 %v1993_v49, %v1993_v49  ;;  %v4296_v49 = vld [vmem:[#allocation7 + $0x10] sm:$0xff]  }
 0x173   :  { %v1998_v31 = vpack.c.bf16 %v1994_v53, %v1994_v53 }
 0x175   :  { %2690 = vmatprep.mubr.bf16.mxu0 %v1998_v31 }
 0x176   :  { %2691 = vmatmul.mubr.bf16.vlgmr.msra.gmra.mxu0 %v1997_v56 }
 0x177   :  { %3630 = vmatpush3.bf16.msra.mxu0 %v4206_v55  ;;  %2772 = vmatprep.mubr.bf16.mxu0 %v1998_v31  ;;  %v4270_v31 = vld [vmem:[#allocation5 + $0x230] ss:$12 sps:$4 sm:$0xff]  }
 0x178   :  { %3631 = vmatprep.subr.bf16.mxu0 %v4207_v57  ;;  %v4272_v57 = vld [vmem:[#allocation5 + $0x218] ss:$12 sps:$4 sm:$0xff]  }
 0x17b   :  { %3632 = vmatpush3.bf16.msra.mxu0 %v4208_v59  ;;  %v4274_v59 = vld [vmem:[#allocation5 + $0x200] ss:$12 sps:$4 sm:$0xff]  }
 0x17c   :  { %3633 = vmatprep.subr.bf16.mxu0 %v4209_v60  ;;  %v4275_v60 = vld [vmem:[#allocation5 + $0x2a8] ss:$12 sps:$4 sm:$0xff]  }
 0x17f   :  { %3634 = vmatpush3.bf16.msra.mxu0 %v4210_v61  ;;  %v4276_v61 = vld [vmem:[#allocation5 + $0x1e8] ss:$12 sps:$4 sm:$0xff]  }
 0x180   :  { %3635 = vmatprep.subr.bf16.mxu0 %v4211_v62  ;;  %v4277_v62 = vld [vmem:[#allocation5 + $0x290] ss:$12 sps:$4 sm:$0xff]  }
 0x183   :  { %3636 = vmatpush3.bf16.msra.mxu0 %v4212_v63  ;;  %v4278_v63 = vld [vmem:[#allocation5 + $0x1d0] ss:$12 sps:$4 sm:$0xff]  }
 0x184   :  { %3637 = vmatprep.subr.bf16.mxu0 %v4213_v0  ;;  %v4279_v0 = vld [vmem:[#allocation5 + $0x278] ss:$12 sps:$4 sm:$0xff]  }
 0x187   :  { %3638 = vmatpush3.bf16.msra.mxu0 %v4214_v1  ;;  %v4280_v1 = vld [vmem:[#allocation5 + $0x1b8] ss:$12 sps:$4 sm:$0xff]  }
 0x188   :  { %3639 = vmatprep.subr.bf16.mxu0 %v4215_v2  ;;  %v4281_v2 = vld [vmem:[#allocation5 + $0x260] ss:$12 sps:$4 sm:$0xff]  }
 0x18b   :  { %3640 = vmatpush3.bf16.msra.mxu0 %v4216_v3  ;;  %v4282_v3 = vld [vmem:[#allocation5 + $0x1a0] ss:$12 sps:$4 sm:$0xff]  }
 0x18c   :  { %3641 = vmatprep.subr.bf16.mxu0 %v4217_v4  ;;  %v4283_v4 = vld [vmem:[#allocation5 + $0x248] ss:$12 sps:$4 sm:$0xff]  }
 0x18f   :  { %3642 = vmatpush3.bf16.msra.mxu0 %v4218_v5  ;;  %v4284_v5 = vld [vmem:[#allocation5 + $0x188] ss:$12 sps:$4 sm:$0xff]  }
 0x190   :  { %3643 = vmatprep.subr.bf16.mxu0 %v4219_v8 }
 0x193   :  { %3644 = vmatpush3.bf16.msra.mxu0 %v4220_v9  ;;  %v4297_v9 = vld [vmem:[#allocation7 + $0x48] sm:$0xff]  }
 0x194   :  { %3673 = vmatprep.subr.bf16.mxu0 %v4285_v21  ;;  %v4302_v21 = vld [vmem:[#allocation7 + $0xb0] sm:$0xff]  }
 0x196   :  { %2773 = vmatmul.mubr.bf16.vlgmr.msra.gmra.mxu0 %v1997_v56  ;;  %v4271_v56 = vld [vmem:[#allocation5 + $0x2d8] ss:$12 sps:$4 sm:$0xff]  }
 0x197   :  { %3674 = vmatpush3.bf16.msra.mxu0 %v4286_v22  ;;  %v4303_v22 = vld [vmem:[#allocation7 + $0xa8] sm:$0xff]  }
 0x198   :  { %3675 = vmatprep.subr.bf16.mxu0 %v4287_v23  ;;  %v4304_v23 = vld [vmem:[#allocation7 + $0xa0] sm:$0xff]  }
 0x19b   :  { %3676 = vmatpush3.bf16.msra.mxu0 %v4288_v33  ;;  %v4306_v33 = vld [vmem:[#allocation7 + $0x90] sm:$0xff]  }
 0x19c   :  { %3677 = vmatprep.subr.bf16.mxu0 %v4289_v34 }
 0x19f   :  { %3678 = vmatpush3.bf16.msra.mxu0 %v4290_v7 }
 0x1a0   :  { %3679 = vmatprep.subr.bf16.mxu0 %v4291_v51 }
 0x1a3   :  { %3680 = vmatpush3.bf16.msra.mxu0 %v4292_v38  ;;  %v2129_v38 = vld [vmem:[%s4629_s4] sm:$0x7] }
 0x1a4   :  { %3681 = vmatprep.subr.bf16.mxu0 %v4293_v17  ;;  %v2134_v17 = vrot.slane %v2129_v38, %v339_v24  ;;  %v2142_v24 = vrot.slane %v2129_v38, %v347_v29  ;;  %v4311_v29 = vld [vmem:[%s4632_s7 + $0x28] sm:$0xff]  }
 0x1a7   :  { %3682 = vmatpush3.bf16.msra.mxu0 %v4294_v42 }
 0x1a8   :  { %3683 = vmatprep.subr.bf16.mxu0 %v4295_v25 }
 0x1aa   :  { %v1863_v10 = vpop.f32.mrf.mxu0 }
 0x1ab   :  { %v1904_v11 = vpop.f32.mrf.mxu1  ;;  %v1864_v35 = vadd.f32 %v1863_v10, %v348_v6  ;;  %3684 = vmatpush3.bf16.msra.mxu0 %v4296_v49 }
 0x1ac   :  { %v1865_v12 = vpop.f32.mrf.mxu0  ;;  %3685 = vmatprep.subr.bf16.mxu0 %v4297_v9 }
 0x1ad   :  { %v1906_v13 = vpop.f32.mrf.mxu1  ;;  %v1866_v16 = vadd.f32 %v1865_v12, %v352_v47  ;;  %v1905_v39 = vadd.f32 %v1904_v11, %v1864_v35  ;;  %v4298_v11 = vld [vmem:[#allocation7 + $0x8] sm:$0xff]  }
 0x1ae   :  { %v1867_v14 = vpop.f32.mrf.mxu0  ;;  %v4307_v47 = vld [vmem:[#allocation7 + $0x88] sm:$0xff]  }
 0x1af   :  { %v1908_v15 = vpop.f32.mrf.mxu1  ;;  %v1907_v40 = vadd.f32 %v1906_v13, %v1866_v16  ;;  %3686 = vmatpush3.bf16.msra.mxu0 %v4298_v11  ;;  %v4299_v13 = vld [vmem:[#allocation7 + $0x40] sm:$0xff]  }
 0x1b0   :  { %v1868_v18 = vpop.f32.mrf.mxu0  ;;  %v4300_v15 = vld [vmem:[#allocation7] sm:$0xff]   ;;  %3687 = vmatprep.subr.bf16.mxu0 %v4299_v13 }
 0x1b1   :  { %v1909_v20 = vpop.f32.mrf.mxu1  ;;  %v4301_v18 = vld [vmem:[#allocation7 + $0xb8] sm:$0xff]   ;;  %v4308_v16 = vld [vmem:[#allocation7 + $0x80] sm:$0xff]  }
 0x1b2   :  { %v4412_v20 = vmov 0.0   ;;  %v3620_v13 = vld [vmem:[%s4633_s8] ss:$0 sm:$0xff] }
 0x1b3   :  { %3688 = vmatpush3.bf16.msra.mxu0 %v4300_v15 }
 0x1b4   :  { %3733 = vmatprep.subr.bf16.mxu0 %v4412_v20 }
 0x1ea   :  { %v1945_v36 = vpop.f32.mrf.mxu0 }
 0x1eb   :  { %v1986_v37 = vpop.f32.mrf.mxu1  ;;  %v1946_v41 = vadd.f32 %v1945_v36, %v1905_v39  ;;  %v2138_v39 = vrot.slane %v2129_v38, %v343_v26 }
 0x1ec   :  { %v1947_v43 = vpop.f32.mrf.mxu0 }
 0x1ed   :  { %v1988_v44 = vpop.f32.mrf.mxu1  ;;  %v1987_v45 = vadd.f32 %v1986_v37, %v1946_v41  ;;  %v1948_v46 = vadd.f32 %v1947_v43, %v1907_v40 }
 0x1ee   :  { %v1949_v48 = vpop.f32.mrf.mxu0 }
 0x1ef   :  { %v1990_v27 = vpop.f32.mrf.mxu1  ;;  %v1989_v30 = vadd.f32 %v1988_v44, %v1948_v46  ;;  %v1995_v50 = vmax.f32 %v1987_v45, 0.0 }
 0x1f0   :  { %v1950_v52 = vpop.f32.mrf.mxu0 }
 0x1f1   :  { %v1991_v28 = vpop.f32.mrf.mxu1  ;;  %v1996_v53 = vmax.f32 %v1989_v30, 0.0  ;;  %v1999_v55 = vpack.c.bf16 %v1995_v50, %v1995_v50 }
 0x1f3   :  { %v2000_v54 = vpack.c.bf16 %v1996_v53, %v1996_v53 }
 0x1f5   :  { %2731 = vmatprep.mubr.bf16.mxu1 %v2000_v54 }
 0x1f6   :  { %2732 = vmatmul.mubr.bf16.vlgmr.msra.gmra.mxu1 %v1999_v55 }
 0x1f7   :  { %3652 = vmatpush3.bf16.msra.mxu1 %v4270_v31  ;;  %2812 = vmatprep.mubr.bf16.mxu1 %v2000_v54 }
 0x1f8   :  { %3653 = vmatprep.subr.bf16.mxu1 %v4271_v56  ;;  %v4312_v56 = vld [vmem:[%s4632_s7 + $0x20] sm:$0xff]  }
 0x1fb   :  { %3654 = vmatpush3.bf16.msra.mxu1 %v4272_v57  ;;  %v4313_v57 = vld [vmem:[%s4632_s7 + $0x18] sm:$0xff]  }
 0x1fc   :  { %3655 = vmatprep.subr.bf16.mxu1 %v4273_v58  ;;  %v4314_v58 = vld [vmem:[%s4632_s7 + $0x10] sm:$0xff]  }
 0x1ff   :  { %3656 = vmatpush3.bf16.msra.mxu1 %v4274_v59  ;;  %v4315_v59 = vld [vmem:[%s4632_s7 + $0x8] sm:$0xff]  }
 0x200   :  { %3657 = vmatprep.subr.bf16.mxu1 %v4275_v60  ;;  %v4316_v60 = vld [vmem:[%s4632_s7] sm:$0xff]  }
 0x203   :  { %3658 = vmatpush3.bf16.msra.mxu1 %v4276_v61 }
 0x204   :  { %3659 = vmatprep.subr.bf16.mxu1 %v4277_v62 }
 0x207   :  { %3660 = vmatpush3.bf16.msra.mxu1 %v4278_v63 }
 0x208   :  { %3661 = vmatprep.subr.bf16.mxu1 %v4279_v0 }
 0x20b   :  { %3662 = vmatpush3.bf16.msra.mxu1 %v4280_v1 }
 0x20c   :  { %3663 = vmatprep.subr.bf16.mxu1 %v4281_v2  ;;  %v3595_v2 = vld [vmem:[%s4631_s6] ss:$0 sm:$0xff]  ;;  %s4377_s6 = scalar_lea.vmem %s3226_s11, 128 }
 0x20d   :  { %p4378_p1 = scmp.ne.s32.totalorder %s3226_s11, %s4377_s6  ;;  %p4383_p3 = scmp.lt.s32.totalorder %s4377_s6, %s4377_s6 }
 0x20f   :  { %3664 = vmatpush3.bf16.msra.mxu1 %v4282_v3  ;;  %p4384_p4 = por %p4383_p3, %p4382_p2 }
 0x210   :  { %3665 = vmatprep.subr.bf16.mxu1 %v4283_v4 }
 0x211   :  { %p4385_p5 = pnand %p4384_p4, %p4378_p1 }
 0x213   :  { %3666 = vmatpush3.bf16.msra.mxu1 %v4284_v5 }
 0x214   :  { %3713 = vmatprep.subr.bf16.mxu1 %v4412_v20 }
 0x216   :  { %2813 = vmatmul.mubr.bf16.vlgmr.msra.gmra.mxu1 %v1999_v55  ;;  %v4309_v55 = vld [vmem:[%s4632_s7 + $0x38] sm:$0xff]  }
 0x217   :  { %3714 = vmatpush3.bf16.msra.mxu1 %v4301_v18  ;;  %3729 = vmatprep.mubr.msk.bf16.mxu1 %vm4413_vm0, %v4412_v20 }
 0x218   :  { %3715 = vmatprep.subr.bf16.mxu1 %v4412_v20 }
 0x21b   :  { %3716 = vmatpush3.bf16.msra.mxu1 %v4302_v21 }
 0x21c   :  { %3717 = vmatprep.subr.bf16.mxu1 %v4412_v20 }
 0x21f   :  { %3718 = vmatpush3.bf16.msra.mxu1 %v4303_v22 }
 0x220   :  { %3719 = vmatprep.subr.bf16.mxu1 %v4412_v20 }
 0x223   :  { %3720 = vmatpush3.bf16.msra.mxu1 %v4304_v23 }
 0x224   :  { %3721 = vmatprep.subr.bf16.mxu1 %v4412_v20 }
 0x227   :  { %3722 = vmatpush3.bf16.msra.mxu1 %v4305_v32 }
 0x228   :  { %3723 = vmatprep.subr.bf16.mxu1 %v4412_v20 }
 0x22b   :  { %3724 = vmatpush3.bf16.msra.mxu1 %v4306_v33 }
 0x22c   :  { %3725 = vmatprep.subr.bf16.mxu1 %v4412_v20 }
 0x22f   :  { %3726 = vmatpush3.bf16.msra.mxu1 %v4307_v47 }
 0x230   :  { %3727 = vmatprep.subr.bf16.mxu1 %v4412_v20 }
 0x233   :  { %3728 = vmatpush3.bf16.msra.mxu1 %v4308_v16 }
 0x236   :  { %v2692_v8 = vpop.f32.mrf.mxu0 }
 0x237   :  { %v2693_v36 = vadd.f32 %v2692_v8, %v2134_v17 }
 0x238   :  { %v2694_v10 = vpop.f32.mrf.mxu0 }
 0x239   :  { %v2695_v40 = vadd.f32 %v2694_v10, %v2138_v39 }
 0x23a   :  { %v2696_v12 = vpop.f32.mrf.mxu0 }
 0x23c   :  { %v2697_v14 = vpop.f32.mrf.mxu0 }
 0x256   :  { %v3645_v34 = vpop.f32.mrf.mxu0 }
 0x258   :  { %v3646_v6 = vpop.f32.mrf.mxu0 }
 0x259   :  { %v3647_v7 = vadd.f32 %v3646_v6, %v3645_v34 }
 0x25a   :  { %v3648_v51 = vpop.f32.mrf.mxu0 }
 0x25b   :  { %v2775_v49 = vadd.f32 %v3647_v7, %v2142_v24 }
 0x25c   :  { %v3649_v35 = vpop.f32.mrf.mxu0 }
 0x2b6   :  { %v2733_v37 = vpop.f32.mrf.mxu1 }
 0x2b7   :  { %v2734_v41 = vadd.f32 %v2733_v37, %v2693_v36 }
 0x2b8   :  { %v2735_v42 = vpop.f32.mrf.mxu1 }
 0x2b9   :  { %v2736_v43 = vadd.f32 %v2735_v42, %v2695_v40  ;;  %v2820_v44 = vmax.f32 %v2734_v41, 0.0 }
 0x2ba   :  { %v2737_v25 = vpop.f32.mrf.mxu1 }
 0x2bb   :  { %v2821_v45 = vmax.f32 %v2736_v43, 0.0  ;;  %v2823_v27 = vpack.c.bf16 %v2820_v44, %v2820_v44 }
 0x2bc   :  { %v2738_v46 = vpop.f32.mrf.mxu1 }
 0x2bd   :  { %v2824_v48 = vpack.c.bf16 %v2821_v45, %v2821_v45 }
 0x2bf   :  { %3057 = vmatprep.mubr.bf16.mxu0 %v2824_v48 }
 0x2c0   :  { %3058 = vmatmul.mubr.bf16.vlgmr.msra.gmra.mxu0 %v2823_v27 }
 0x2c1   :  { %3749 = vmatprep.mubr.msk.bf16.mxu0 %vm4413_vm0, %v4412_v20  ;;  %3734 = vmatpush3.bf16.msra.mxu0 %v4309_v55 }
 0x2c2   :  { %3735 = vmatprep.subr.bf16.mxu0 %v4412_v20 }
 0x2c5   :  { %3736 = vmatpush3.bf16.msra.mxu0 %v4310_v19 }
 0x2c6   :  { %3737 = vmatprep.subr.bf16.mxu0 %v4412_v20 }
 0x2c9   :  { %3738 = vmatpush3.bf16.msra.mxu0 %v4311_v29 }
 0x2ca   :  { %3739 = vmatprep.subr.bf16.mxu0 %v4412_v20 }
 0x2cd   :  { %3740 = vmatpush3.bf16.msra.mxu0 %v4312_v56 }
 0x2ce   :  { %3741 = vmatprep.subr.bf16.mxu0 %v4412_v20 }
 0x2d1   :  { %3742 = vmatpush3.bf16.msra.mxu0 %v4313_v57 }
 0x2d2   :  { %3743 = vmatprep.subr.bf16.mxu0 %v4412_v20 }
 0x2d5   :  { %3744 = vmatpush3.bf16.msra.mxu0 %v4314_v58 }
 0x2d6   :  { %v3667_v26 = vpop.f32.mrf.mxu1  ;;  %3745 = vmatprep.subr.bf16.mxu0 %v4412_v20 }
 0x2d8   :  { %v3668_v30 = vpop.f32.mrf.mxu1 }
 0x2d9   :  { %v3669_v50 = vadd.f32 %v3668_v30, %v3667_v26  ;;  %3746 = vmatpush3.bf16.msra.mxu0 %v4315_v59 }
 0x2da   :  { %v3670_v52 = vpop.f32.mrf.mxu1  ;;  %3747 = vmatprep.subr.bf16.mxu0 %v4412_v20 }
 0x2db   :  { %v2815_v28 = vadd.f32 %v3669_v50, %v2775_v49 }
 0x2dc   :  { %v3671_v53 = vpop.f32.mrf.mxu1 }
 0x2dd   :  { %v2822_v54 = vmax.f32 %v2815_v28, 0.0  ;;  %3748 = vmatpush3.bf16.msra.mxu0 %v4316_v60 }
 0x2df   :  { %v2825_v31 = vpack.c.bf16 %v2822_v54, %v2822_v54 }
 0x2e1   :  { %3730 = vmatmul.mubr.bf16.vlgmr.msra.gmra.mxu1 %v2825_v31 }
 0x380   :  { %v3689_v61 = vpop.f32.mrf.mxu0 }
 0x382   :  { %v3690_v62 = vpop.f32.mrf.mxu0 }
 0x383   :  { %v3691_v1 = vadd.f32 %v3690_v62, %v3689_v61 }
 0x384   :  { %v3692_v63 = vpop.f32.mrf.mxu0 }
 0x385   :  { %v3060_v3 = vadd.f32 %v3691_v1, %v3595_v2 }
 0x386   :  { %v3693_v0 = vpop.f32.mrf.mxu0 }
 0x3a1   :  { %v3099_v4 = vpop.f32.mrf.mxu1 }
 0x3a2   :  { %v3100_v5 = vadd.f32 %v3099_v4, %v3060_v3 }
 0x3a3   :  { %v3731_v8 = vpop.f32.mrf.mxu1 }
 0x3a4   :  { %v3105_v9 = vmax.f32 %v3100_v5, 0.0 }
 0x3a5   :  { %v3102_v10 = vpop.f32.mrf.mxu1 }
 0x3a6   :  { %v3106_v11 = vpack.c.bf16 %v3105_v9, %v3105_v9 }
 0x3a7   :  { %v3732_v12 = vpop.f32.mrf.mxu1 }
 0x3a8   :  { %3750 = vmatmul.mubr.bf16.vlgmr.msra.gmra.mxu0 %v3106_v11 }
 0x468   :  { %v3212_v14 = vpop.f32.mrf.mxu0 }
 0x469   :  { %v3213_v15 = vadd.f32 %v3620_v13, %v3212_v14 }
 0x46a   :  { %v3751_v18 = vpop.f32.mrf.mxu0 }
 0x46b   :  { %3218 = vst [vmem:[#allocation8] sm:$0xff] %v3213_v15 }
 0x46c   :  { %v3215_v20 = vpop.f32.mrf.mxu0 }
 0x46d   :  { %4388 = shalt.err (!%p4385_p5)
}
 0x46e   :  { %3228 = dma.vmem_to_hbm [thread:$0]  %s3226_s11, 128, %s4634_s9, [#allocation4]   ;;  %v3752_v21 = vpop.f32.mrf.mxu0 }
 0x46f   :  { %4401 = dma.done.wait [#allocation4], 128  }
 0x470   :  { %4402 = vsyncadd [#allocation4], 4294967168 }
 0x471   :  { %3232 = vsyncpa [#allocation3], 1 }
 0x472   :  { %3233 = vsyncpa [#allocation6], 1 }
 0x473   :  { %3234 = vsyncpa [#allocation4], 1 }

</bundles_post_ra>
